<compile_context>
chip_gen: v7x
topology: tpu7x:2x2x1
jax: 0.10.0
libtpu: 0.0.40
codegen_flags: <defaults>
</compile_context>

<pallas_src>
import jax
import jax.numpy as jnp
from jax.experimental import pallas as pl
from jax.experimental.pallas import tpu as pltpu


_ALPHA = 0.2   # leaky_relu negative slope
_P_DROP = 0.3  # dropout probability


def discriminator_kernel(x_ref, m1_ref, m2_ref, m3_ref,
                         w1_ref, b1_ref, w2_ref, b2_ref,
                         w3_ref, b3_ref, w4_ref, b4_ref,
                         out_ref):
    alpha = jnp.float32(_ALPHA)

    # ---- fc1 -> leaky_relu -> dropout --------------------------------------
    h = jnp.dot(x_ref[...].astype(jnp.bfloat16), w1_ref[...],
                preferred_element_type=jnp.float32) + b1_ref[...]
    h = jnp.where(h >= 0, h, alpha * h) * m1_ref[...]

    # ---- fc2 -> leaky_relu -> dropout --------------------------------------
    h = jnp.dot(h.astype(jnp.bfloat16), w2_ref[...],
                preferred_element_type=jnp.float32) + b2_ref[...]
    h = jnp.where(h >= 0, h, alpha * h) * m2_ref[...]

    # ---- fc3 -> leaky_relu -> dropout --------------------------------------
    h = jnp.dot(h.astype(jnp.bfloat16), w3_ref[...],
                preferred_element_type=jnp.float32) + b3_ref[...]
    h = jnp.where(h >= 0, h, alpha * h) * m3_ref[...]

    # ---- fc4 (256 -> 1): VPU multiply + lane-axis reduce, then sigmoid -----
    logits = jnp.sum(h * w4_ref[...], axis=-1, keepdims=True) + b4_ref[...]
    out_ref[...] = 1.0 / (1.0 + jnp.exp(-logits))


def discriminator_forward(x, params, dropout_key):
    """Forward pass matching Discriminator.forward (training-mode dropout)."""
    (w1, b1), (w2, b2), (w3, b3), (w4, b4) = params
    B, _ = x.shape
    h1, h2, h3 = w1.shape[1], w2.shape[1], w3.shape[1]

    # Dropout keep-masks, pre-scaled by 1/(1-p): values are {0, 1/(1-p)}.
    k1, k2, k3 = jax.random.split(dropout_key, 3)
    keep = 1.0 - _P_DROP
    scale = 1.0 / keep
    m1 = jax.random.bernoulli(k1, keep, (B, h1)).astype(jnp.float32) * scale
    m2 = jax.random.bernoulli(k2, keep, (B, h2)).astype(jnp.float32) * scale
    m3 = jax.random.bernoulli(k3, keep, (B, h3)).astype(jnp.float32) * scale

    # Batch tiling: one tile at small B; tiles of 128 rows for large B.
    TB = B if B <= 128 else 128
    grid = (pl.cdiv(B, TB),)

    def batched(arr):   # blocked along batch, full feature width
        return pl.BlockSpec((TB, arr.shape[1]), lambda i: (i, 0))

    def resident(arr):  # whole array, same block every grid step (weights/biases)
        return pl.BlockSpec(arr.shape, lambda i: (0, 0))

    args = (x, m1, m2, m3, w1, b1, w2, b2, w3, b3, w4, b4)
    in_specs = [batched(x), batched(m1), batched(m2), batched(m3),
                resident(w1), resident(b1), resident(w2), resident(b2),
                resident(w3), resident(b3), resident(w4), resident(b4)]

    return pl.pallas_call(
        discriminator_kernel,
        out_shape=jax.ShapeDtypeStruct((B, 1), jnp.float32),
        grid=grid,
        in_specs=in_specs,
        out_specs=pl.BlockSpec((TB, 1), lambda i: (i, 0)),
        compiler_params=pltpu.CompilerParams(
            dimension_semantics=("parallel",),
            vmem_limit_bytes=32 << 20,
        ),
    )(*args)


def init_linear(key, fan_in, fan_out, w_dtype=jnp.bfloat16):
    # Mimics torch.nn.Linear init U(-1/sqrt(fan_in), 1/sqrt(fan_in)).
    kw, kb = jax.random.split(key)
    bound = 1.0 / (fan_in ** 0.5)
    w = jax.random.uniform(kw, (fan_in, fan_out), jnp.float32, -bound, bound)
    b = jax.random.uniform(kb, (1, fan_out), jnp.float32, -bound, bound)
    return w.astype(w_dtype), b


def init_discriminator_params(key, input_size):
    k1, k2, k3, k4 = jax.random.split(key, 4)
    p1 = init_linear(k1, input_size, 1024)           # bf16 weights (big)
    p2 = init_linear(k2, 1024, 512)
    p3 = init_linear(k3, 512, 256)
    w4, b4 = init_linear(k4, 256, 1, w_dtype=jnp.float32)
    # Final layer used as a row vector for the VPU reduce path.
    p4 = (w4.reshape(1, 256), b4.reshape(1, 1))
    return (p1, p2, p3, p4)


if __name__ == "__main__":
    key = jax.random.PRNGKey(0)
    k_params, k_x, k_drop = jax.random.split(key, 3)

    input_size = 256
    batch = 8

    params = init_discriminator_params(k_params, input_size)
    x = jax.random.normal(k_x, (batch, input_size), dtype=jnp.float32)

    out = discriminator_forward(x, params, dropout_key=k_drop)
    out = jax.block_until_ready(out)

    assert out.shape == (batch, 1)
    assert bool(jnp.all((out >= 0.0) & (out <= 1.0)))
    print("KERNEL_OK")
</pallas_src>

<mosaic_0001>
module attributes {stable_mosaic.version = 11 : i64} {
  func.func @discriminator_kernel(%arg0: i32, %arg1: memref<8x256xf32, #tpu.memory_space<vmem>>, %arg2: memref<8x1024xf32, #tpu.memory_space<vmem>>, %arg3: memref<8x512xf32, #tpu.memory_space<vmem>>, %arg4: memref<8x256xf32, #tpu.memory_space<vmem>>, %arg5: memref<256x1024xbf16, #tpu.memory_space<vmem>>, %arg6: memref<1x1024xf32, #tpu.memory_space<vmem>>, %arg7: memref<1024x512xbf16, #tpu.memory_space<vmem>>, %arg8: memref<1x512xf32, #tpu.memory_space<vmem>>, %arg9: memref<512x256xbf16, #tpu.memory_space<vmem>>, %arg10: memref<1x256xf32, #tpu.memory_space<vmem>>, %arg11: memref<1x256xf32, #tpu.memory_space<vmem>>, %arg12: memref<1x1xf32, #tpu.memory_space<vmem>>, %arg13: memref<8x1xf32, #tpu.memory_space<vmem>>) attributes {dimension_semantics = [#tpu.dimension_semantics<parallel>], iteration_bounds = array<i64: 1>, scalar_prefetch = 0 : i64, scratch_operands = 0 : i64, tpu.core_type = #tpu.core_type<tc>, window_params = [{transform_indices = @transform_0, window_bounds = array<i64: 8, 256>}, {transform_indices = @transform_1, window_bounds = array<i64: 8, 1024>}, {transform_indices = @transform_2, window_bounds = array<i64: 8, 512>}, {transform_indices = @transform_3, window_bounds = array<i64: 8, 256>}, {pipeline_mode = #tpu.pipeline_mode<synchronous>, transform_indices = @transform_4, window_bounds = array<i64: 256, 1024>}, {pipeline_mode = #tpu.pipeline_mode<synchronous>, transform_indices = @transform_5, window_bounds = array<i64: 1, 1024>}, {pipeline_mode = #tpu.pipeline_mode<synchronous>, transform_indices = @transform_6, window_bounds = array<i64: 1024, 512>}, {pipeline_mode = #tpu.pipeline_mode<synchronous>, transform_indices = @transform_7, window_bounds = array<i64: 1, 512>}, {pipeline_mode = #tpu.pipeline_mode<synchronous>, transform_indices = @transform_8, window_bounds = array<i64: 512, 256>}, {pipeline_mode = #tpu.pipeline_mode<synchronous>, transform_indices = @transform_9, window_bounds = array<i64: 1, 256>}, {pipeline_mode = #tpu.pipeline_mode<synchronous>, transform_indices = @transform_10, window_bounds = array<i64: 1, 256>}, {pipeline_mode = #tpu.pipeline_mode<synchronous>, transform_indices = @transform_11, window_bounds = array<i64: 1, 1>}, {transform_indices = @transform_12, window_bounds = array<i64: 8, 1>}]} {
    %c0 = arith.constant 0 : index
    %c0_0 = arith.constant 0 : index
    %0 = vector.load %arg1[%c0, %c0_0] : memref<8x256xf32, #tpu.memory_space<vmem>>, vector<8x256xf32>
    %1 = arith.truncf %0 : vector<8x256xf32> to vector<8x256xbf16>
    %c0_1 = arith.constant 0 : index
    %c0_2 = arith.constant 0 : index
    %2 = vector.load %arg5[%c0_1, %c0_2] : memref<256x1024xbf16, #tpu.memory_space<vmem>>, vector<256x1024xbf16>
    %cst = arith.constant dense<0.000000e+00> : vector<8x1024xf32>
    %3 = tpu.matmul %1, %2, %cst {dimension_numbers = #tpu.dot_dimension_numbers<[1], [0], [0], [1], [0, 0, 1, 1], [], []>} : vector<8x256xbf16>, vector<256x1024xbf16>, vector<8x1024xf32> -> vector<8x1024xf32>
    %c0_3 = arith.constant 0 : index
    %c0_4 = arith.constant 0 : index
    %4 = vector.load %arg6[%c0_3, %c0_4] : memref<1x1024xf32, #tpu.memory_space<vmem>>, vector<1x1024xf32>
    %5 = vector.broadcast %4 : vector<1x1024xf32> to vector<8x1024xf32>
    %6 = arith.addf %3, %5 : vector<8x1024xf32>
    %cst_5 = arith.constant 0.000000e+00 : f32
    %7 = vector.broadcast %cst_5 : f32 to vector<8x1024xf32>
    %8 = arith.cmpf oge, %6, %7 : vector<8x1024xf32>
    %cst_6 = arith.constant 2.000000e-01 : f32
    %9 = vector.broadcast %cst_6 : f32 to vector<8x1024xf32>
    %10 = arith.mulf %9, %6 : vector<8x1024xf32>
    %11 = arith.select %8, %6, %10 : vector<8x1024xi1>, vector<8x1024xf32>
    %c0_7 = arith.constant 0 : index
    %c0_8 = arith.constant 0 : index
    %12 = vector.load %arg2[%c0_7, %c0_8] : memref<8x1024xf32, #tpu.memory_space<vmem>>, vector<8x1024xf32>
    %13 = arith.mulf %11, %12 : vector<8x1024xf32>
    %14 = arith.truncf %13 : vector<8x1024xf32> to vector<8x1024xbf16>
    %c0_9 = arith.constant 0 : index
    %c0_10 = arith.constant 0 : index
    %15 = vector.load %arg7[%c0_9, %c0_10] : memref<1024x512xbf16, #tpu.memory_space<vmem>>, vector<1024x512xbf16>
    %cst_11 = arith.constant dense<0.000000e+00> : vector<8x512xf32>
    %16 = tpu.matmul %14, %15, %cst_11 {dimension_numbers = #tpu.dot_dimension_numbers<[1], [0], [0], [1], [0, 0, 1, 1], [], []>} : vector<8x1024xbf16>, vector<1024x512xbf16>, vector<8x512xf32> -> vector<8x512xf32>
    %c0_12 = arith.constant 0 : index
    %c0_13 = arith.constant 0 : index
    %17 = vector.load %arg8[%c0_12, %c0_13] : memref<1x512xf32, #tpu.memory_space<vmem>>, vector<1x512xf32>
    %18 = vector.broadcast %17 : vector<1x512xf32> to vector<8x512xf32>
    %19 = arith.addf %16, %18 : vector<8x512xf32>
    %cst_14 = arith.constant 0.000000e+00 : f32
    %20 = vector.broadcast %cst_14 : f32 to vector<8x512xf32>
    %21 = arith.cmpf oge, %19, %20 : vector<8x512xf32>
    %cst_15 = arith.constant 2.000000e-01 : f32
    %22 = vector.broadcast %cst_15 : f32 to vector<8x512xf32>
    %23 = arith.mulf %22, %19 : vector<8x512xf32>
    %24 = arith.select %21, %19, %23 : vector<8x512xi1>, vector<8x512xf32>
    %c0_16 = arith.constant 0 : index
    %c0_17 = arith.constant 0 : index
    %25 = vector.load %arg3[%c0_16, %c0_17] : memref<8x512xf32, #tpu.memory_space<vmem>>, vector<8x512xf32>
    %26 = arith.mulf %24, %25 : vector<8x512xf32>
    %27 = arith.truncf %26 : vector<8x512xf32> to vector<8x512xbf16>
    %c0_18 = arith.constant 0 : index
    %c0_19 = arith.constant 0 : index
    %28 = vector.load %arg9[%c0_18, %c0_19] : memref<512x256xbf16, #tpu.memory_space<vmem>>, vector<512x256xbf16>
    %cst_20 = arith.constant dense<0.000000e+00> : vector<8x256xf32>
    %29 = tpu.matmul %27, %28, %cst_20 {dimension_numbers = #tpu.dot_dimension_numbers<[1], [0], [0], [1], [0, 0, 1, 1], [], []>} : vector<8x512xbf16>, vector<512x256xbf16>, vector<8x256xf32> -> vector<8x256xf32>
    %c0_21 = arith.constant 0 : index
    %c0_22 = arith.constant 0 : index
    %30 = vector.load %arg10[%c0_21, %c0_22] : memref<1x256xf32, #tpu.memory_space<vmem>>, vector<1x256xf32>
    %31 = vector.broadcast %30 : vector<1x256xf32> to vector<8x256xf32>
    %32 = arith.addf %29, %31 : vector<8x256xf32>
    %cst_23 = arith.constant 0.000000e+00 : f32
    %33 = vector.broadcast %cst_23 : f32 to vector<8x256xf32>
    %34 = arith.cmpf oge, %32, %33 : vector<8x256xf32>
    %cst_24 = arith.constant 2.000000e-01 : f32
    %35 = vector.broadcast %cst_24 : f32 to vector<8x256xf32>
    %36 = arith.mulf %35, %32 : vector<8x256xf32>
    %37 = arith.select %34, %32, %36 : vector<8x256xi1>, vector<8x256xf32>
    %c0_25 = arith.constant 0 : index
    %c0_26 = arith.constant 0 : index
    %38 = vector.load %arg4[%c0_25, %c0_26] : memref<8x256xf32, #tpu.memory_space<vmem>>, vector<8x256xf32>
    %39 = arith.mulf %37, %38 : vector<8x256xf32>
    %c0_27 = arith.constant 0 : index
    %c0_28 = arith.constant 0 : index
    %40 = vector.load %arg11[%c0_27, %c0_28] : memref<1x256xf32, #tpu.memory_space<vmem>>, vector<1x256xf32>
    %41 = vector.broadcast %40 : vector<1x256xf32> to vector<8x256xf32>
    %42 = arith.mulf %39, %41 : vector<8x256xf32>
    %cst_29 = arith.constant dense<0.000000e+00> : vector<8xf32>
    %43 = vector.multi_reduction <add>, %42, %cst_29 [1] : vector<8x256xf32> to vector<8xf32>
    %44 = vector.shape_cast %43 : vector<8xf32> to vector<8x1xf32>
    %c0_30 = arith.constant 0 : index
    %c0_31 = arith.constant 0 : index
    %45 = vector.load %arg12[%c0_30, %c0_31] : memref<1x1xf32, #tpu.memory_space<vmem>>, vector<1x1xf32>
    %46 = vector.broadcast %45 : vector<1x1xf32> to vector<8x1xf32>
    %47 = arith.addf %44, %46 : vector<8x1xf32>
    %cst_32 = arith.constant 0.000000e+00 : f32
    %48 = vector.broadcast %cst_32 : f32 to vector<8x1xf32>
    %49 = arith.subf %48, %47 : vector<8x1xf32>
    %50 = math.exp %49 : vector<8x1xf32>
    %cst_33 = arith.constant 1.000000e+00 : f32
    %51 = vector.broadcast %cst_33 : f32 to vector<8x1xf32>
    %52 = arith.addf %51, %50 : vector<8x1xf32>
    %cst_34 = arith.constant 1.000000e+00 : f32
    %53 = vector.broadcast %cst_34 : f32 to vector<8x1xf32>
    %54 = arith.divf %53, %52 : vector<8x1xf32>
    %c0_35 = arith.constant 0 : index
    %c0_36 = arith.constant 0 : index
    %55 = vector.load %arg13[%c0_35, %c0_36] : memref<8x1xf32, #tpu.memory_space<vmem>>, vector<8x1xf32>
    tpu.vector_store %arg13[%c0_35, %c0_36], %54 {strides = array<i32>} : memref<8x1xf32, #tpu.memory_space<vmem>>, vector<8x1xf32>,
    return
  }
  func.func @transform_0(%arg0: i32) -> (i32, i32) {
    %c0_i32 = arith.constant 0 : i32
    %c0_i32_0 = arith.constant 0 : i32
    return %arg0, %c0_i32 : i32, i32
  }
  func.func @transform_1(%arg0: i32) -> (i32, i32) {
    %c0_i32 = arith.constant 0 : i32
    %c0_i32_0 = arith.constant 0 : i32
    return %arg0, %c0_i32 : i32, i32
  }
  func.func @transform_2(%arg0: i32) -> (i32, i32) {
    %c0_i32 = arith.constant 0 : i32
    %c0_i32_0 = arith.constant 0 : i32
    return %arg0, %c0_i32 : i32, i32
  }
  func.func @transform_3(%arg0: i32) -> (i32, i32) {
    %c0_i32 = arith.constant 0 : i32
    %c0_i32_0 = arith.constant 0 : i32
    return %arg0, %c0_i32 : i32, i32
  }
  func.func @transform_4(%arg0: i32) -> (i32, i32) {
    %c0_i32 = arith.constant 0 : i32
    %c0_i32_0 = arith.constant 0 : i32
    %c0_i32_1 = arith.constant 0 : i32
    return %c0_i32, %c0_i32_0 : i32, i32
  }
  func.func @transform_5(%arg0: i32) -> (i32, i32) {
    %c0_i32 = arith.constant 0 : i32
    %c0_i32_0 = arith.constant 0 : i32
    %c0_i32_1 = arith.constant 0 : i32
    return %c0_i32, %c0_i32_0 : i32, i32
  }
  func.func @transform_6(%arg0: i32) -> (i32, i32) {
    %c0_i32 = arith.constant 0 : i32
    %c0_i32_0 = arith.constant 0 : i32
    %c0_i32_1 = arith.constant 0 : i32
    return %c0_i32, %c0_i32_0 : i32, i32
  }
  func.func @transform_7(%arg0: i32) -> (i32, i32) {
    %c0_i32 = arith.constant 0 : i32
    %c0_i32_0 = arith.constant 0 : i32
    %c0_i32_1 = arith.constant 0 : i32
    return %c0_i32, %c0_i32_0 : i32, i32
  }
  func.func @transform_8(%arg0: i32) -> (i32, i32) {
    %c0_i32 = arith.constant 0 : i32
    %c0_i32_0 = arith.constant 0 : i32
    %c0_i32_1 = arith.constant 0 : i32
    return %c0_i32, %c0_i32_0 : i32, i32
  }
  func.func @transform_9(%arg0: i32) -> (i32, i32) {
    %c0_i32 = arith.constant 0 : i32
    %c0_i32_0 = arith.constant 0 : i32
    %c0_i32_1 = arith.constant 0 : i32
    return %c0_i32, %c0_i32_0 : i32, i32
  }
  func.func @transform_10(%arg0: i32) -> (i32, i32) {
    %c0_i32 = arith.constant 0 : i32
    %c0_i32_0 = arith.constant 0 : i32
    %c0_i32_1 = arith.constant 0 : i32
    return %c0_i32, %c0_i32_0 : i32, i32
  }
  func.func @transform_11(%arg0: i32) -> (i32, i32) {
    %c0_i32 = arith.constant 0 : i32
    %c0_i32_0 = arith.constant 0 : i32
    %c0_i32_1 = arith.constant 0 : i32
    return %c0_i32, %c0_i32_0 : i32, i32
  }
  func.func @transform_12(%arg0: i32) -> (i32, i32) {
    %c0_i32 = arith.constant 0 : i32
    %c0_i32_0 = arith.constant 0 : i32
    return %arg0, %c0_i32 : i32, i32
  }
}

</mosaic_0001>

<bundles_post_ra>
// kernel: tpu_custom_call.1
= control target key start
LH: loop header
LB: loop body
LE: loop exit
PB: predicated region body
PF: predicated region fallthrough
CT: control target
= control target key end

     0   :  { %s4987_s0 = inlined_call_operand.hbm [shape: f32[8,256], index: 0, kind: input, shape index: {}]   ;;  %s4988_s1 = inlined_call_operand.hbm [shape: f32[8,1024], index: 1, kind: input, shape index: {}]   ;;  %s4989_s2 = inlined_call_operand.hbm [shape: f32[8,512], index: 2, kind: input, shape index: {}]   ;;  %s4990_s3 = inlined_call_operand.hbm [shape: f32[8,256], index: 3, kind: input, shape index: {}]   ;;  %s4991_s4 = inlined_call_operand.hbm [shape: bf16[256,1024], index: 4, kind: input, shape index: {}]   ;;  %s4992_s5 = inlined_call_operand.vmem [shape: f32[1,1024], index: 5, kind: input, shape index: {}]   ;;  %s4993_s6 = inlined_call_operand.hbm [shape: bf16[1024,512], index: 6, kind: input, shape index: {}]   ;;  %s4994_s7 = inlined_call_operand.vmem [shape: f32[1,512], index: 7, kind: input, shape index: {}]   ;;  %s4995_s8 = inlined_call_operand.hbm [shape: bf16[512,256], index: 8, kind: input, shape index: {}]   ;;  %s4996_s9 = inlined_call_operand.vmem [shape: f32[1,256], index: 9, kind: input, shape index: {}]   ;;  %s4997_s10 = inlined_call_operand.vmem [shape: f32[1,256], index: 10, kind: input, shape index: {}]   ;;  %s4998_s11 = inlined_call_operand.<no memory space> [shape: f32[1,1], index: 11, kind: input, shape index: {}]   ;;  %s4999_s12 = inlined_call_operand.vmem [shape: f32[8,1], index: 12, kind: output, shape index: {}]  }
   0x1   :  { %v17_v0 = vstv %s4998_s11 }
   0x2   :  { %18 = vst [vmem:[#allocation2] sm:$0x1] %v17_v0 }
   0x3   :  { %19 = vsyncpa [#allocation4], 0 }
   0x4   :  { %20 = vsyncpa [#allocation6], 0 }
   0x5   :  { %21 = vsyncpa [#allocation9], 0 }
   0x6   :  { %22 = vsyncpa [#allocation12], 0  ;;  %s4737_s23 = smov [#allocation5]   ;;  %s4738_s25 = smov [#allocation8]  }
   0x7   :  { %s39_s24 = sshll.u32 %s4737_s23, 4  ;;  %s59_s26 = sshll.u32 %s4738_s25, 4  ;;  %s40_s24 = int_to_ptr.vmem [resolvable:$true] %s39_s24  ;;  %s60_s26 = int_to_ptr.vmem [resolvable:$true] %s59_s26 }
   0x8   :  { %s4575_s29 = scalar_lea.hbm %s4988_s1, 1024 }
   0x9   :  { %p4576_p0 = scmp.ne.s32.totalorder %s4988_s1, %s4575_s29  ;;  %p4579_p1 = scmp.lt.u32.totalorder %s4575_s29, %s4988_s1 }
   0xb   :  { %p4581_p2 = pnand %p4579_p1, %p4576_p0 }
   0xd   :  { %4584 = shalt.err (!%p4581_p2)
}
   0xe   :  { %s4585_s15 = scalar_lea.vmem %s40_s24, 1024  ;;  %p4590_p4 = scmp.lt.s32.totalorder %s40_s24, %s40_s24 }
   0xf   :  { %p4586_p3 = scmp.ne.s32.totalorder %s40_s24, %s4585_s15  ;;  %p4591_p5 = scmp.lt.s32.totalorder %s4585_s15, %s4585_s15 }
  0x11   :  { %p4592_p6 = por %p4591_p5, %p4590_p4 }
  0x13   :  { %p4593_p7 = pnand %p4592_p6, %p4586_p3 }
  0x15   :  { %4596 = shalt.err (!%p4593_p7)
}
  0x16   :  { %42 = dma.hbm_to_vmem [thread:$0]  %s4988_s1, 1024, %s40_s24, [#allocation6]  }
  0x17   :  { %s4597_s20 = scalar_lea.hbm %s4990_s3, 256 }
  0x18   :  { %p4598_p8 = scmp.ne.s32.totalorder %s4990_s3, %s4597_s20  ;;  %p4601_p9 = scmp.lt.u32.totalorder %s4597_s20, %s4990_s3 }
  0x1a   :  { %p4603_p10 = pnand %p4601_p9, %p4598_p8 }
  0x1c   :  { %4606 = shalt.err (!%p4603_p10)
}
  0x1d   :  { %s4607_s27 = scalar_lea.vmem %s60_s26, 256  ;;  %p4612_p12 = scmp.lt.s32.totalorder %s60_s26, %s60_s26 }
  0x1e   :  { %p4608_p11 = scmp.ne.s32.totalorder %s60_s26, %s4607_s27  ;;  %p4613_p13 = scmp.lt.s32.totalorder %s4607_s27, %s4607_s27 }
  0x20   :  { %p4614_p0 = por %p4613_p13, %p4612_p12 }
  0x22   :  { %p4615_p1 = pnand %p4614_p0, %p4608_p11 }
  0x24   :  { %4618 = shalt.err (!%p4615_p1)
}
  0x25   :  { %62 = dma.hbm_to_vmem [thread:$0]  %s4990_s3, 256, %s60_s26, [#allocation9]  }
  0x26   :  { %s4739_s28 = smov [#allocation11]   ;;  %s4619_s11 = scalar_lea.hbm %s4993_s6, 32768 }
  0x27   :  { %s82_s29 = sshll.u32 %s4739_s28, 4  ;;  %p4620_p2 = scmp.ne.s32.totalorder %s4993_s6, %s4619_s11  ;;  %s83_s29 = int_to_ptr.vmem [resolvable:$true] %s82_s29 }
  0x28   :  { %p4623_p3 = scmp.lt.u32.totalorder %s4619_s11, %s4993_s6 }
  0x2a   :  { %p4625_p4 = pnand %p4623_p3, %p4620_p2 }
  0x2c   :  { %4628 = shalt.err (!%p4625_p4)
}
  0x2d   :  { %s4629_s18 = scalar_lea.vmem %s83_s29, 32768  ;;  %p4634_p6 = scmp.lt.s32.totalorder %s83_s29, %s83_s29 }
  0x2e   :  { %p4630_p5 = scmp.ne.s32.totalorder %s83_s29, %s4629_s18  ;;  %p4635_p7 = scmp.lt.s32.totalorder %s4629_s18, %s4629_s18 }
  0x30   :  { %p4636_p8 = por %p4635_p7, %p4634_p6 }
  0x32   :  { %p4637_p9 = pnand %p4636_p8, %p4630_p5 }
  0x34   :  { %4640 = shalt.err (!%p4637_p9)
}
  0x35   :  { %s4740_s3 = smov 256   ;;  %s4741_s26 = smov 16  }
  0x36   :  { %88 = dma.hbm_to_vmem [thread:$0]  %s4993_s6, 32768, %s83_s29, [#allocation12], %s4740_s3, %s4740_s3, %s4741_s26  }
  0x37   :  { %s4742_s21 = smov [#allocation3]   ;;  %s4743_s23 = smov [#allocation7]  }
  0x38   :  { %s29_s22 = sshll.u32 %s4742_s21, 4  ;;  %s49_s25 = sshll.u32 %s4743_s23, 4  ;;  %s30_s22 = int_to_ptr.vmem [resolvable:$true] %s29_s22  ;;  %s50_s25 = int_to_ptr.vmem [resolvable:$true] %s49_s25 }
  0x39   :  { %s4641_s24 = scalar_lea.hbm %s4987_s0, 256 }
  0x3a   :  { %p4642_p10 = scmp.ne.s32.totalorder %s4987_s0, %s4641_s24  ;;  %p4645_p11 = scmp.lt.u32.totalorder %s4641_s24, %s4987_s0 }
  0x3c   :  { %p4647_p12 = pnand %p4645_p11, %p4642_p10 }
  0x3e   :  { %4650 = shalt.err (!%p4647_p12)
}
  0x3f   :  { %s4651_s6 = scalar_lea.vmem %s30_s22, 256  ;;  %p4656_p0 = scmp.lt.s32.totalorder %s30_s22, %s30_s22 }
  0x40   :  { %p4652_p13 = scmp.ne.s32.totalorder %s30_s22, %s4651_s6  ;;  %p4657_p1 = scmp.lt.s32.totalorder %s4651_s6, %s4651_s6 }
  0x42   :  { %p4658_p2 = por %p4657_p1, %p4656_p0 }
  0x44   :  { %p4659_p3 = pnand %p4658_p2, %p4652_p13 }
  0x46   :  { %4662 = shalt.err (!%p4659_p3)
}
  0x47   :  { %32 = dma.hbm_to_vmem [thread:$0]  %s4987_s0, 256, %s30_s22, [#allocation4]  }
  0x48   :  { %s4663_s17 = scalar_lea.hbm %s4989_s2, 512 }
  0x49   :  { %p4664_p4 = scmp.ne.s32.totalorder %s4989_s2, %s4663_s17  ;;  %p4667_p5 = scmp.lt.u32.totalorder %s4663_s17, %s4989_s2 }
  0x4b   :  { %p4669_p6 = pnand %p4667_p5, %p4664_p4 }
  0x4d   :  { %4672 = shalt.err (!%p4669_p6)
}
  0x4e   :  { %s4673_s20 = scalar_lea.vmem %s50_s25, 512  ;;  %p4678_p8 = scmp.lt.s32.totalorder %s50_s25, %s50_s25 }
  0x4f   :  { %p4674_p7 = scmp.ne.s32.totalorder %s50_s25, %s4673_s20  ;;  %p4679_p9 = scmp.lt.s32.totalorder %s4673_s20, %s4673_s20 }
  0x51   :  { %p4680_p10 = por %p4679_p9, %p4678_p8 }
  0x53   :  { %p4681_p11 = pnand %p4680_p10, %p4674_p7 }
  0x55   :  { %4684 = shalt.err (!%p4681_p11)
}
  0x56   :  { %52 = dma.hbm_to_vmem [thread:$0]  %s4989_s2, 512, %s50_s25, [#allocation6]  }
  0x57   :  { %s4744_s22 = smov [#allocation10]   ;;  %s4685_s24 = scalar_lea.hbm %s4991_s4, 16384 }
  0x58   :  { %s68_s23 = sshll.u32 %s4744_s22, 4  ;;  %p4686_p12 = scmp.ne.s32.totalorder %s4991_s4, %s4685_s24  ;;  %s69_s23 = int_to_ptr.vmem [resolvable:$true] %s68_s23 }
  0x59   :  { %p4689_p13 = scmp.lt.u32.totalorder %s4685_s24, %s4991_s4 }
  0x5b   :  { %p4691_p0 = pnand %p4689_p13, %p4686_p12 }
  0x5d   :  { %4694 = shalt.err (!%p4691_p0)
}
  0x5e   :  { %s4695_s6 = scalar_lea.vmem %s69_s23, 16384  ;;  %p4700_p2 = scmp.lt.s32.totalorder %s69_s23, %s69_s23 }
  0x5f   :  { %p4696_p1 = scmp.ne.s32.totalorder %s69_s23, %s4695_s6  ;;  %p4701_p3 = scmp.lt.s32.totalorder %s4695_s6, %s4695_s6 }
  0x61   :  { %p4702_p4 = por %p4701_p3, %p4700_p2 }
  0x63   :  { %p4703_p5 = pnand %p4702_p4, %p4696_p1 }
  0x65   :  { %4706 = shalt.err (!%p4703_p5)
}
  0x66   :  { %s4745_s2 = smov 512   ;;  %s4746_s25 = smov 32  }
  0x67   :  { %74 = dma.hbm_to_vmem [thread:$0]  %s4991_s4, 16384, %s69_s23, [#allocation9], %s4745_s2, %s4745_s2, %s4746_s25  }
  0x68   :  { %s4747_s15 = smov [#allocation13]   ;;  %s4707_s3 = scalar_lea.hbm %s4995_s8, 8192 }
  0x69   :  { %s96_s16 = sshll.u32 %s4747_s15, 4  ;;  %p4708_p6 = scmp.ne.s32.totalorder %s4995_s8, %s4707_s3  ;;  %s97_s16 = int_to_ptr.vmem [resolvable:$true] %s96_s16 }
  0x6a   :  { %p4711_p7 = scmp.lt.u32.totalorder %s4707_s3, %s4995_s8 }
  0x6c   :  { %p4713_p8 = pnand %p4711_p7, %p4708_p6 }
  0x6e   :  { %4716 = shalt.err (!%p4713_p8)
}
  0x6f   :  { %s4717_s21 = scalar_lea.vmem %s97_s16, 8192  ;;  %p4722_p10 = scmp.lt.s32.totalorder %s97_s16, %s97_s16 }
  0x70   :  { %p4718_p9 = scmp.ne.s32.totalorder %s97_s16, %s4717_s21  ;;  %p4723_p11 = scmp.lt.s32.totalorder %s4717_s21, %s4717_s21 }
  0x72   :  { %p4724_p12 = por %p4723_p11, %p4722_p10 }
  0x74   :  { %p4725_p13 = pnand %p4724_p12, %p4718_p9 }
  0x76   :  { %4728 = shalt.err (!%p4725_p13)
}
  0x77   :  { %s4748_s4 = smov 128   ;;  %s4749_s22 = smov 8  }
  0x78   :  { %102 = dma.hbm_to_vmem [thread:$0]  %s4995_s8, 8192, %s97_s16, [#allocation12], %s4748_s4, %s4748_s4, %s4749_s22  }
  0x79   :  { %4729 = dma.done.wait [#allocation4], 256  }
  0x7a   :  { %4730 = vsyncadd [#allocation4], 4294967040 }
  0x7b   :  { %4731 = dma.done.wait [#allocation6], 1536  }
  0x7c   :  { %4732 = vsyncadd [#allocation6], 4294965760 }
  0x7d   :  { %4733 = dma.done.wait [#allocation9], 16640  }
  0x7e   :  { %4734 = vsyncadd [#allocation9], 4294950656 }
  0x7f   :  { %4735 = dma.done.wait [#allocation12], 40960  }
  0x80   :  { %4736 = vsyncadd [#allocation12], 4294926336  ;;  %v134_v1 = vld [vmem:[#allocation10] sm:$0xff]  ;;  %v131_v18 = vld [vmem:[#allocation3 + $0x8] sm:$0xff]  ;;  %vm3585_vm14 = vcmask 7168  }
  0x81   :  { %v138_v2 = vld [vmem:[#allocation10 + $0x20] sm:$0xff]  ;;  %v4902_v19 = vpack.c.bf16 %v131_v18, %v131_v18  ;;  %v136_v32 = vld [vmem:[#allocation10 + $0x10] sm:$0xff] }
  0x82   :  { %v142_v3 = vld [vmem:[#allocation10 + $0x40] sm:$0xff]  ;;  %v3596_v4 = vcombine.high %v134_v1, %v138_v2  ;;  %v3595_v5 = vcombine.low %v134_v1, %v138_v2  ;;  %v140_v33 = vld [vmem:[#allocation10 + $0x30] sm:$0xff] }
  0x83   :  { %v146_v6 = vld [vmem:[#allocation10 + $0x60] sm:$0xff]  ;;  %976 = vmatprep.mubr.bf16.mxu1 %v4902_v19  ;;  %1058 = vmatprep.mubr.bf16.mxu0 %v4902_v19  ;;  %v144_v34 = vld [vmem:[#allocation10 + $0x50] sm:$0xff]  ;;  %v3600_v35 = vcombine.high %v136_v32, %v140_v33  ;;  %v3599_v36 = vcombine.low %v136_v32, %v140_v33 }
  0x84   :  { %v3604_v7 = vcombine.high %v142_v3, %v146_v6  ;;  %v150_v8 = vld [vmem:[#allocation10 + $0x80] sm:$0xff]  ;;  %944 = vmatprep.subr.bf16.mxu1 %v3596_v4  ;;  %v3603_v10 = vcombine.low %v142_v3, %v146_v6  ;;  %v148_v37 = vld [vmem:[#allocation10 + $0x70] sm:$0xff] }
  0x85   :  { %v154_v9 = vld [vmem:[#allocation10 + $0xa0] sm:$0xff]  ;;  %945 = vmatpush1.bf16.msra.mxu1 %v3595_v5  ;;  %v3608_v39 = vcombine.high %v144_v34, %v148_v37  ;;  %v152_v40 = vld [vmem:[#allocation10 + $0x90] sm:$0xff]  ;;  %1026 = vmatprep.subr.bf16.mxu0 %v3600_v35  ;;  %v3607_v45 = vcombine.low %v144_v34, %v148_v37 }
  0x86   :  { %946 = vmatprep.subr.bf16.mxu1 %v3604_v7  ;;  %v3612_v11 = vcombine.high %v150_v8, %v154_v9  ;;  %v158_v12 = vld [vmem:[#allocation10 + $0xc0] sm:$0xff]  ;;  %v3611_v14 = vcombine.low %v150_v8, %v154_v9  ;;  %v156_v41 = vld [vmem:[#allocation10 + $0xb0] sm:$0xff]  ;;  %1027 = vmatpush1.bf16.msra.mxu0 %v3599_v36 }
  0x87   :  { %v162_v13 = vld [vmem:[#allocation10 + $0xe0] sm:$0xff]  ;;  %1028 = vmatprep.subr.bf16.mxu0 %v3608_v39  ;;  %v3616_v46 = vcombine.high %v152_v40, %v156_v41  ;;  %v160_v48 = vld [vmem:[#allocation10 + $0xd0] sm:$0xff]  ;;  %v3615_v53 = vcombine.low %v152_v40, %v156_v41  ;;  %v135_v41 = vld [vmem:[#allocation10 + $0x8] sm:$0xff] }
  0x88   :  { %v3620_v15 = vcombine.high %v158_v12, %v162_v13  ;;  %v166_v16 = vld [vmem:[#allocation10 + $0x100] sm:$0xff]  ;;  %v3619_v20 = vcombine.low %v158_v12, %v162_v13  ;;  %v164_v49 = vld [vmem:[#allocation10 + $0xf0] sm:$0xff] }
  0x89   :  { %947 = vmatpush1.bf16.msra.mxu1 %v3603_v10  ;;  %v170_v17 = vld [vmem:[#allocation10 + $0x120] sm:$0xff]  ;;  %v3624_v54 = vcombine.high %v160_v48, %v164_v49  ;;  %v168_v56 = vld [vmem:[#allocation10 + $0x110] sm:$0xff]  ;;  %v3623_v61 = vcombine.low %v160_v48, %v164_v49 }
  0x8a   :  { %948 = vmatprep.subr.bf16.mxu1 %v3612_v11  ;;  %v3628_v21 = vcombine.high %v166_v16, %v170_v17  ;;  %v174_v22 = vld [vmem:[#allocation10 + $0x140] sm:$0xff]  ;;  %v3627_v24 = vcombine.low %v166_v16, %v170_v17  ;;  %1029 = vmatpush1.bf16.msra.mxu0 %v3607_v45  ;;  %v172_v57 = vld [vmem:[#allocation10 + $0x130] sm:$0xff] }
  0x8b   :  { %v178_v23 = vld [vmem:[#allocation10 + $0x160] sm:$0xff]  ;;  %1030 = vmatprep.subr.bf16.mxu0 %v3616_v46  ;;  %v3632_v62 = vcombine.high %v168_v56, %v172_v57  ;;  %v176_v0 = vld [vmem:[#allocation10 + $0x150] sm:$0xff]  ;;  %v3631_v5 = vcombine.low %v168_v56, %v172_v57 }
  0x8c   :  { %v3636_v25 = vcombine.high %v174_v22, %v178_v23  ;;  %v182_v26 = vld [vmem:[#allocation10 + $0x180] sm:$0xff]  ;;  %v3635_v28 = vcombine.low %v174_v22, %v178_v23  ;;  %v180_v1 = vld [vmem:[#allocation10 + $0x170] sm:$0xff] }
  0x8d   :  { %949 = vmatpush1.bf16.msra.mxu1 %v3611_v14  ;;  %v186_v27 = vld [vmem:[#allocation10 + $0x1a0] sm:$0xff]  ;;  %v3640_v6 = vcombine.high %v176_v0, %v180_v1  ;;  %v184_v10 = vld [vmem:[#allocation10 + $0x190] sm:$0xff]  ;;  %v3639_v13 = vcombine.low %v176_v0, %v180_v1 }
  0x8e   :  { %950 = vmatprep.subr.bf16.mxu1 %v3620_v15  ;;  %v3644_v29 = vcombine.high %v182_v26, %v186_v27  ;;  %v190_v30 = vld [vmem:[#allocation10 + $0x1c0] sm:$0xff]  ;;  %v3643_v38 = vcombine.low %v182_v26, %v186_v27  ;;  %1031 = vmatpush1.bf16.msra.mxu0 %v3615_v53  ;;  %v188_v11 = vld [vmem:[#allocation10 + $0x1b0] sm:$0xff] }
  0x8f   :  { %v194_v31 = vld [vmem:[#allocation10 + $0x1e0] sm:$0xff]  ;;  %1032 = vmatprep.subr.bf16.mxu0 %v3624_v54  ;;  %v3648_v14 = vcombine.high %v184_v10, %v188_v11  ;;  %v192_v18 = vld [vmem:[#allocation10 + $0x1d0] sm:$0xff]  ;;  %v3647_v22 = vcombine.low %v184_v10, %v188_v11  ;;  %v167_v11 = vld [vmem:[#allocation10 + $0x108] sm:$0xff] }
  0x90   :  { %v3652_v42 = vcombine.high %v190_v30, %v194_v31  ;;  %v198_v43 = vld [vmem:[#allocation10 + $0x200] sm:$0xff]  ;;  %v3651_v47 = vcombine.low %v190_v30, %v194_v31  ;;  %v200_v27 = vld [vmem:[#allocation10 + $0x210] sm:$0xff] }
  0x91   :  { %951 = vmatpush1.bf16.msra.mxu1 %v3619_v20  ;;  %v202_v44 = vld [vmem:[#allocation10 + $0x220] sm:$0xff]  ;;  %v196_v20 = vld [vmem:[#allocation10 + $0x1f0] sm:$0xff] }
  0x92   :  { %952 = vmatprep.subr.bf16.mxu1 %v3628_v21  ;;  %v3660_v50 = vcombine.high %v198_v43, %v202_v44  ;;  %v206_v51 = vld [vmem:[#allocation10 + $0x240] sm:$0xff]  ;;  %v3659_v55 = vcombine.low %v198_v43, %v202_v44  ;;  %1033 = vmatpush1.bf16.msra.mxu0 %v3623_v61  ;;  %v3656_v23 = vcombine.high %v192_v18, %v196_v20  ;;  %v208_v35 = vld [vmem:[#allocation10 + $0x250] sm:$0xff] }
  0x93   :  { %v210_v52 = vld [vmem:[#allocation10 + $0x260] sm:$0xff]  ;;  %1034 = vmatprep.subr.bf16.mxu0 %v3632_v62  ;;  %v3655_v30 = vcombine.low %v192_v18, %v196_v20  ;;  %v212_v36 = vld [vmem:[#allocation10 + $0x270] sm:$0xff]  ;;  %v175_v20 = vld [vmem:[#allocation10 + $0x148] sm:$0xff] }
  0x94   :  { %v3668_v58 = vcombine.high %v206_v51, %v210_v52  ;;  %v214_v59 = vld [vmem:[#allocation10 + $0x280] sm:$0xff]  ;;  %v3667_v63 = vcombine.low %v206_v51, %v210_v52  ;;  %v3672_v39 = vcombine.high %v208_v35, %v212_v36  ;;  %v216_v43 = vld [vmem:[#allocation10 + $0x290] sm:$0xff]  ;;  %v147_v51 = vld [vmem:[#allocation10 + $0x68] sm:$0xff] }
  0x95   :  { %953 = vmatpush1.bf16.msra.mxu1 %v3627_v24  ;;  %v218_v60 = vld [vmem:[#allocation10 + $0x2a0] sm:$0xff]  ;;  %v220_v44 = vld [vmem:[#allocation10 + $0x2b0] sm:$0xff] }
  0x96   :  { %954 = vmatprep.subr.bf16.mxu1 %v3636_v25  ;;  %v3676_v2 = vcombine.high %v214_v59, %v218_v60  ;;  %v222_v3 = vld [vmem:[#allocation10 + $0x2c0] sm:$0xff]  ;;  %v3675_v7 = vcombine.low %v214_v59, %v218_v60  ;;  %1035 = vmatpush1.bf16.msra.mxu0 %v3631_v5  ;;  %v3680_v48 = vcombine.high %v216_v43, %v220_v44  ;;  %v224_v52 = vld [vmem:[#allocation10 + $0x2d0] sm:$0xff]  ;;  %v151_v59 = vld [vmem:[#allocation10 + $0x88] sm:$0xff] }
  0x97   :  { %v226_v4 = vld [vmem:[#allocation10 + $0x2e0] sm:$0xff]  ;;  %1036 = vmatprep.subr.bf16.mxu0 %v3640_v6  ;;  %v228_v53 = vld [vmem:[#allocation10 + $0x2f0] sm:$0xff] }
  0x98   :  { %v230_v8 = vld [vmem:[#allocation10 + $0x300] sm:$0xff]  ;;  %v3684_v12 = vcombine.high %v222_v3, %v226_v4  ;;  %v3683_v15 = vcombine.low %v222_v3, %v226_v4  ;;  %v3688_v57 = vcombine.high %v224_v52, %v228_v53  ;;  %v232_v60 = vld [vmem:[#allocation10 + $0x310] sm:$0xff]  ;;  %v3687_v0 = vcombine.low %v224_v52, %v228_v53  ;;  %v159_v3 = vld [vmem:[#allocation10 + $0xc8] sm:$0xff] }
  0x99   :  { %955 = vmatpush1.bf16.msra.mxu1 %v3635_v28  ;;  %v234_v9 = vld [vmem:[#allocation10 + $0x320] sm:$0xff]  ;;  %v204_v28 = vld [vmem:[#allocation10 + $0x230] sm:$0xff]  ;;  %v215_v52 = vld [vmem:[#allocation10 + $0x288] sm:$0xff] }
  0x9a   :  { %956 = vmatprep.subr.bf16.mxu1 %v3644_v29  ;;  %v238_v16 = vld [vmem:[#allocation10 + $0x340] sm:$0xff]  ;;  %v3692_v21 = vcombine.high %v230_v8, %v234_v9  ;;  %1037 = vmatpush1.bf16.msra.mxu0 %v3639_v13  ;;  %v3691_v24 = vcombine.low %v230_v8, %v234_v9  ;;  %v3664_v31 = vcombine.high %v200_v27, %v204_v28  ;;  %v236_v61 = vld [vmem:[#allocation10 + $0x330] sm:$0xff]  ;;  %v219_v53 = vld [vmem:[#allocation10 + $0x2a8] sm:$0xff] }
  0x9b   :  { %v242_v17 = vld [vmem:[#allocation10 + $0x360] sm:$0xff]  ;;  %1038 = vmatprep.subr.bf16.mxu0 %v3648_v14  ;;  %v3696_v1 = vcombine.high %v232_v60, %v236_v61  ;;  %v240_v4 = vld [vmem:[#allocation10 + $0x350] sm:$0xff]  ;;  %v3695_v8 = vcombine.low %v232_v60, %v236_v61  ;;  %v227_v60 = vld [vmem:[#allocation10 + $0x2e8] sm:$0xff] }
  0x9c   :  { %v246_v25 = vld [vmem:[#allocation10 + $0x380] sm:$0xff]  ;;  %v3700_v29 = vcombine.high %v238_v16, %v242_v17  ;;  %v3699_v32 = vcombine.low %v238_v16, %v242_v17  ;;  %v244_v5 = vld [vmem:[#allocation10 + $0x370] sm:$0xff] }
  0x9d   :  { %957 = vmatpush1.bf16.msra.mxu1 %v3643_v38  ;;  %v250_v26 = vld [vmem:[#allocation10 + $0x3a0] sm:$0xff]  ;;  %v3663_v38 = vcombine.low %v200_v27, %v204_v28  ;;  %v3704_v9 = vcombine.high %v240_v4, %v244_v5  ;;  %v252_v13 = vld [vmem:[#allocation10 + $0x3b0] sm:$0xff]  ;;  %v3703_v16 = vcombine.low %v240_v4, %v244_v5  ;;  %v183_v28 = vld [vmem:[#allocation10 + $0x188] sm:$0xff] }
  0x9e   :  { %958 = vmatprep.subr.bf16.mxu1 %v3652_v42  ;;  %1039 = vmatpush1.bf16.msra.mxu0 %v3647_v22  ;;  %v254_v33 = vld [vmem:[#allocation10 + $0x3c0] sm:$0xff]  ;;  %v3708_v37 = vcombine.high %v246_v25, %v250_v26  ;;  %v3707_v40 = vcombine.low %v246_v25, %v250_v26  ;;  %v139_v42 = vld [vmem:[#allocation10 + $0x28] sm:$0xff]  ;;  %v260_v22 = vld [vmem:[#allocation10 + $0x3f0] sm:$0xff] }
  0x9f   :  { %1040 = vmatprep.subr.bf16.mxu0 %v3656_v23  ;;  %v258_v34 = vld [vmem:[#allocation10 + $0x3e0] sm:$0xff]  ;;  %v3598_v54 = vcombine.high %v135_v41, %v139_v42 }
  0xa0   :  { %v3716_v45 = vcombine.high %v254_v33, %v258_v34  ;;  %v130_v46 = vld [vmem:[#allocation3] sm:$0xff]  ;;  %v3715_v49 = vcombine.low %v254_v33, %v258_v34  ;;  %v191_v34 = vld [vmem:[#allocation10 + $0x1c8] sm:$0xff] }
  0xa1   :  { %959 = vmatpush1.bf16.msra.mxu1 %v3651_v47  ;;  %v3671_v47 = vcombine.low %v208_v35, %v212_v36  ;;  %v4906_v56 = vpack.c.bf16 %v130_v46, %v130_v46  ;;  %v195_v35 = vld [vmem:[#allocation10 + $0x1e8] sm:$0xff]  ;;  %v4091_v36 = vld [vmem:[#allocation11] ss:$16 sps:$4 sm:$0xff]   ;;  %v4129_v5 = vld [vmem:[#allocation11 + $0xc4] ss:$16 sps:$4 sm:$0xff]  }
  0xa2   :  { %960 = vmatprep.subr.bf16.mxu1 %v3660_v50  ;;  %1041 = vmatpush1.bf16.msra.mxu0 %v3655_v30  ;;  %v143_v50 = vld [vmem:[#allocation10 + $0x48] sm:$0xff]  ;;  %v4115_v61 = vld [vmem:[#allocation11 + $0x80] ss:$16 sps:$4 sm:$0xff]  }
  0xa3   :  { %1042 = vmatprep.subr.bf16.mxu0 %v3664_v31  ;;  %v3606_v62 = vcombine.high %v143_v50, %v147_v51  ;;  %v4093_v31 = vld [vmem:[#allocation11 + $0x4] ss:$16 sps:$4 sm:$0xff]   ;;  %v207_v46 = vld [vmem:[#allocation10 + $0x248] sm:$0xff] }
  0xa5   :  { %961 = vmatpush1.bf16.msra.mxu1 %v3659_v55  ;;  %v3679_v55 = vcombine.low %v216_v43, %v220_v44  ;;  %v3654_v43 = vcombine.high %v191_v34, %v195_v35  ;;  %v4105_v44 = vld [vmem:[#allocation11 + $0x44] ss:$16 sps:$4 sm:$0xff]  }
  0xa6   :  { %962 = vmatprep.subr.bf16.mxu1 %v3668_v58  ;;  %1043 = vmatpush1.bf16.msra.mxu0 %v3663_v38  ;;  %v3597_v58 = vcombine.low %v135_v41, %v139_v42  ;;  %v4099_v38 = vld [vmem:[#allocation11 + $0x24] ss:$16 sps:$4 sm:$0xff]   ;;  %v203_v41 = vld [vmem:[#allocation10 + $0x228] sm:$0xff]  ;;  %v4097_v42 = vld [vmem:[#allocation11 + $0x20] ss:$16 sps:$4 sm:$0xff]  }
  0xa7   :  { %1044 = vmatprep.subr.bf16.mxu0 %v3672_v39 }
  0xa9   :  { %963 = vmatpush1.bf16.msra.mxu1 %v3667_v63  ;;  %v155_v63 = vld [vmem:[#allocation10 + $0xa8] sm:$0xff] }
  0xaa   :  { %964 = vmatprep.subr.bf16.mxu1 %v3676_v2  ;;  %1045 = vmatpush1.bf16.msra.mxu0 %v3671_v47  ;;  %v3605_v2 = vcombine.low %v143_v50, %v147_v51  ;;  %v3614_v6 = vcombine.high %v151_v59, %v155_v63  ;;  %v3613_v10 = vcombine.low %v151_v59, %v155_v63  ;;  %v211_v47 = vld [vmem:[#allocation10 + $0x268] sm:$0xff]  ;;  %v4111_v50 = vld [vmem:[#allocation11 + $0x64] ss:$16 sps:$4 sm:$0xff]  }
  0xab   :  { %1046 = vmatprep.subr.bf16.mxu0 %v3680_v48  ;;  %v4103_v48 = vld [vmem:[#allocation11 + $0x40] ss:$16 sps:$4 sm:$0xff]   ;;  %v223_v59 = vld [vmem:[#allocation10 + $0x2c8] sm:$0xff]  ;;  %v4123_v63 = vld [vmem:[#allocation11 + $0xa4] ss:$16 sps:$4 sm:$0xff]  }
  0xac   :  { %v3686_v4 = vcombine.high %v223_v59, %v227_v60 }
  0xad   :  { %965 = vmatpush1.bf16.msra.mxu1 %v3675_v7  ;;  %v163_v7 = vld [vmem:[#allocation10 + $0xe8] sm:$0xff] }
  0xae   :  { %966 = vmatprep.subr.bf16.mxu1 %v3684_v12  ;;  %1047 = vmatpush1.bf16.msra.mxu0 %v3679_v55  ;;  %v248_v12 = vld [vmem:[#allocation10 + $0x390] sm:$0xff]  ;;  %v3622_v14 = vcombine.high %v159_v3, %v163_v7  ;;  %v3621_v18 = vcombine.low %v159_v3, %v163_v7  ;;  %v3670_v55 = vcombine.high %v207_v46, %v211_v47  ;;  %v239_v7 = vld [vmem:[#allocation10 + $0x348] sm:$0xff] }
  0xaf   :  { %1048 = vmatprep.subr.bf16.mxu0 %v3688_v57  ;;  %v3712_v17 = vcombine.high %v248_v12, %v252_v13  ;;  %v3711_v25 = vcombine.low %v248_v12, %v252_v13  ;;  %v4117_v57 = vld [vmem:[#allocation11 + $0x84] ss:$16 sps:$4 sm:$0xff]   ;;  %v4121_v3 = vld [vmem:[#allocation11 + $0xa0] ss:$16 sps:$4 sm:$0xff]   ;;  %v247_v13 = vld [vmem:[#allocation10 + $0x388] sm:$0xff] }
  0xb1   :  { %967 = vmatpush1.bf16.msra.mxu1 %v3683_v15  ;;  %v171_v15 = vld [vmem:[#allocation10 + $0x128] sm:$0xff] }
  0xb2   :  { %968 = vmatprep.subr.bf16.mxu1 %v3692_v21  ;;  %1049 = vmatpush1.bf16.msra.mxu0 %v3687_v0  ;;  %v256_v21 = vld [vmem:[#allocation10 + $0x3d0] sm:$0xff]  ;;  %v3630_v23 = vcombine.high %v167_v11, %v171_v15  ;;  %v3629_v27 = vcombine.low %v167_v11, %v171_v15  ;;  %v3677_v0 = vcombine.low %v215_v52, %v219_v53 }
  0xb3   :  { %1050 = vmatprep.subr.bf16.mxu0 %v3696_v1  ;;  %v3720_v26 = vcombine.high %v256_v21, %v260_v22  ;;  %v231_v1 = vld [vmem:[#allocation10 + $0x308] sm:$0xff]  ;;  %v4135_v11 = vld [vmem:[#allocation11 + $0xe4] ss:$16 sps:$4 sm:$0xff]   ;;  %v4133_v15 = vld [vmem:[#allocation11 + $0xe0] ss:$16 sps:$4 sm:$0xff]  }
  0xb5   :  { %969 = vmatpush1.bf16.msra.mxu1 %v3691_v24  ;;  %v179_v24 = vld [vmem:[#allocation10 + $0x168] sm:$0xff] }
  0xb6   :  { %970 = vmatprep.subr.bf16.mxu1 %v3700_v29  ;;  %1051 = vmatpush1.bf16.msra.mxu0 %v3695_v8  ;;  %v187_v29 = vld [vmem:[#allocation10 + $0x1a8] sm:$0xff]  ;;  %v3638_v30 = vcombine.high %v175_v20, %v179_v24  ;;  %v3637_v33 = vcombine.low %v175_v20, %v179_v24  ;;  %v4147_v24 = vld [vmem:[#allocation11 + $0x124] ss:$16 sps:$4 sm:$0xff]  }
  0xb7   :  { %1052 = vmatprep.subr.bf16.mxu0 %v3704_v9  ;;  %v3645_v39 = vcombine.low %v183_v28, %v187_v29  ;;  %v243_v8 = vld [vmem:[#allocation10 + $0x368] sm:$0xff]  ;;  %v4127_v9 = vld [vmem:[#allocation11 + $0xc0] ss:$16 sps:$4 sm:$0xff]  }
  0xb8   :  { %v255_v20 = vld [vmem:[#allocation10 + $0x3c8] sm:$0xff] }
  0xb9   :  { %971 = vmatpush1.bf16.msra.mxu1 %v3699_v32  ;;  %v3719_v32 = vcombine.low %v256_v21, %v260_v22  ;;  %v259_v21 = vld [vmem:[#allocation10 + $0x3e8] sm:$0xff] }
  0xba   :  { %972 = vmatprep.subr.bf16.mxu1 %v3708_v37  ;;  %1053 = vmatpush1.bf16.msra.mxu0 %v3703_v16  ;;  %v3646_v37 = vcombine.high %v183_v28, %v187_v29  ;;  %v3702_v16 = vcombine.high %v239_v7, %v243_v8  ;;  %v4145_v28 = vld [vmem:[#allocation11 + $0x120] ss:$16 sps:$4 sm:$0xff]   ;;  %v3718_v29 = vcombine.high %v255_v20, %v259_v21 }
  0xbb   :  { %1054 = vmatprep.subr.bf16.mxu0 %v3712_v17  ;;  %v4141_v17 = vld [vmem:[#allocation11 + $0x104] ss:$16 sps:$4 sm:$0xff]  }
  0xbd   :  { %973 = vmatpush1.bf16.msra.mxu1 %v3707_v40  ;;  %v199_v40 = vld [vmem:[#allocation10 + $0x208] sm:$0xff] }
  0xbe   :  { %974 = vmatprep.subr.bf16.mxu1 %v3716_v45  ;;  %1055 = vmatpush1.bf16.msra.mxu0 %v3711_v25  ;;  %v3653_v45 = vcombine.low %v191_v34, %v195_v35  ;;  %v3661_v51 = vcombine.low %v199_v40, %v203_v41  ;;  %v4151_v34 = vld [vmem:[#allocation11 + $0x140] ss:$16 sps:$4 sm:$0xff]  }
  0xbf   :  { %1056 = vmatprep.subr.bf16.mxu0 %v3720_v26  ;;  %v137_v26 = vld [vmem:[#allocation10 + $0x18] sm:$0xff] }
  0xc1   :  { %975 = vmatpush1.bf16.msra.mxu1 %v3715_v49  ;;  %v3662_v49 = vcombine.high %v199_v40, %v203_v41  ;;  %v4157_v40 = vld [vmem:[#allocation11 + $0x160] ss:$16 sps:$4 sm:$0xff]  }
  0xc2   :  { %985 = vmatprep.subr.bf16.mxu1 %v3598_v54  ;;  %1057 = vmatpush1.bf16.msra.mxu0 %v3719_v32  ;;  %v4109_v54 = vld [vmem:[#allocation11 + $0x60] ss:$16 sps:$4 sm:$0xff]   ;;  %v145_v32 = vld [vmem:[#allocation10 + $0x58] sm:$0xff] }
  0xc3   :  { %2714 = vmatprep.subr.bf16.mxu0 %v4093_v31  ;;  %v3717_v31 = vcombine.low %v255_v20, %v259_v21  ;;  %v225_v21 = vld [vmem:[#allocation10 + $0x2d8] sm:$0xff] }
  0xc4   :  { %977 = vmatmul.mubr.bf16.vlgmr.msra.gmra.mrb[0].mxu1 %v4906_v56 }
  0xc5   :  { %986 = vmatpush1.bf16.msra.mxu1 %v3597_v58  ;;  %1017 = vmatprep.mubr.bf16.mxu1 %v4902_v19  ;;  %v3669_v58 = vcombine.low %v207_v46, %v211_v47  ;;  %v4163_v46 = vld [vmem:[#allocation11 + $0x180] ss:$16 sps:$4 sm:$0xff]  }
  0xc6   :  { %987 = vmatprep.subr.bf16.mxu1 %v3606_v62  ;;  %1059 = vmatmul.mubr.bf16.vlgmr.msra.gmra.mrb[0].mxu0 %v4906_v56  ;;  %v3678_v62 = vcombine.high %v215_v52, %v219_v53  ;;  %v4169_v52 = vld [vmem:[#allocation11 + $0x1a0] ss:$16 sps:$4 sm:$0xff]  }
  0xc7   :  { %2715 = vmatpush1.bf16.msra.mxu0 %v4091_v36  ;;  %v4159_v36 = vld [vmem:[#allocation11 + $0x164] ss:$16 sps:$4 sm:$0xff]  }
  0xc8   :  { %2716 = vmatprep.subr.bf16.mxu0 %v4099_v38  ;;  %v153_v38 = vld [vmem:[#allocation10 + $0x98] sm:$0xff] }
  0xc9   :  { %988 = vmatpush1.bf16.msra.mxu1 %v3605_v2  ;;  %v235_v2 = vld [vmem:[#allocation10 + $0x328] sm:$0xff] }
  0xca   :  { %989 = vmatprep.subr.bf16.mxu1 %v3614_v6  ;;  %v3685_v6 = vcombine.low %v223_v59, %v227_v60  ;;  %v3693_v12 = vcombine.low %v231_v1, %v235_v2  ;;  %v185_v59 = vld [vmem:[#allocation10 + $0x198] sm:$0xff] }
  0xcb   :  { %2717 = vmatpush1.bf16.msra.mxu0 %v4097_v42  ;;  %v4165_v42 = vld [vmem:[#allocation11 + $0x184] ss:$16 sps:$4 sm:$0xff]   ;;  %v189_v60 = vld [vmem:[#allocation10 + $0x1b8] sm:$0xff] }
  0xcc   :  { %2718 = vmatprep.subr.bf16.mxu0 %v4105_v44  ;;  %v161_v44 = vld [vmem:[#allocation10 + $0xd8] sm:$0xff] }
  0xcd   :  { %990 = vmatpush1.bf16.msra.mxu1 %v3613_v10  ;;  %v3694_v10 = vcombine.high %v231_v1, %v235_v2  ;;  %v3650_v1 = vcombine.high %v185_v59, %v189_v60  ;;  %v4177_v2 = vld [vmem:[#allocation11 + $0x1c4] ss:$16 sps:$4 sm:$0xff]  }
  0xce   :  { %991 = vmatprep.subr.bf16.mxu1 %v3622_v14  ;;  %v251_v14 = vld [vmem:[#allocation10 + $0x3a8] sm:$0xff] }
  0xcf   :  { %2719 = vmatpush1.bf16.msra.mxu0 %v4103_v48  ;;  %v3710_v22 = vcombine.high %v247_v13, %v251_v14  ;;  %v3709_v25 = vcombine.low %v247_v13, %v251_v14  ;;  %v4171_v48 = vld [vmem:[#allocation11 + $0x1a4] ss:$16 sps:$4 sm:$0xff]  }
  0xd0   :  { %2720 = vmatprep.subr.bf16.mxu0 %v4111_v50  ;;  %v169_v50 = vld [vmem:[#allocation10 + $0x118] sm:$0xff]  ;;  %v4189_v14 = vld [vmem:[#allocation11 + $0x204] ss:$16 sps:$4 sm:$0xff]  }
  0xd1   :  { %992 = vmatpush1.bf16.msra.mxu1 %v3621_v18  ;;  %v3701_v18 = vcombine.low %v239_v7, %v243_v8  ;;  %v4183_v8 = vld [vmem:[#allocation11 + $0x1e4] ss:$16 sps:$4 sm:$0xff]  }
  0xd2   :  { %993 = vmatprep.subr.bf16.mxu1 %v3630_v23  ;;  %v4139_v23 = vld [vmem:[#allocation11 + $0x100] ss:$16 sps:$4 sm:$0xff]  }
  0xd3   :  { %2721 = vmatpush1.bf16.msra.mxu0 %v4109_v54 }
  0xd4   :  { %2722 = vmatprep.subr.bf16.mxu0 %v4117_v57  ;;  %v181_v57 = vld [vmem:[#allocation10 + $0x178] sm:$0xff] }
  0xd5   :  { %994 = vmatpush1.bf16.msra.mxu1 %v3629_v27  ;;  %v141_v27 = vld [vmem:[#allocation10 + $0x38] sm:$0xff] }
  0xd6   :  { %995 = vmatprep.subr.bf16.mxu1 %v3638_v30  ;;  %v4153_v30 = vld [vmem:[#allocation11 + $0x144] ss:$16 sps:$4 sm:$0xff]   ;;  %v3602_v35 = vcombine.high %v137_v26, %v141_v27 }
  0xd7   :  { %2723 = vmatpush1.bf16.msra.mxu0 %v4115_v61 }
  0xd8   :  { %2724 = vmatprep.subr.bf16.mxu0 %v4123_v63  ;;  %v193_v63 = vld [vmem:[#allocation10 + $0x1d8] sm:$0xff] }
  0xd9   :  { %996 = vmatpush1.bf16.msra.mxu1 %v3637_v33  ;;  %v149_v33 = vld [vmem:[#allocation10 + $0x78] sm:$0xff] }
  0xda   :  { %997 = vmatprep.subr.bf16.mxu1 %v3646_v37  ;;  %v3601_v37 = vcombine.low %v137_v26, %v141_v27  ;;  %v3610_v41 = vcombine.high %v145_v32, %v149_v33  ;;  %v237_v26 = vld [vmem:[#allocation10 + $0x338] sm:$0xff] }
  0xdb   :  { %2725 = vmatpush1.bf16.msra.mxu0 %v4121_v3  ;;  %v3649_v3 = vcombine.low %v185_v59, %v189_v60  ;;  %v4142_v59 = vld [vmem:[#allocation11 + $0x108] ss:$16 sps:$4 sm:$0xff]   ;;  %v4150_v60 = vld [vmem:[#allocation11 + $0x12c] ss:$16 sps:$4 sm:$0xff]  }
  0xdc   :  { %2726 = vmatprep.subr.bf16.mxu0 %v4129_v5  ;;  %v205_v5 = vld [vmem:[#allocation10 + $0x238] sm:$0xff] }
  0xdd   :  { %998 = vmatpush1.bf16.msra.mxu1 %v3645_v39  ;;  %v157_v39 = vld [vmem:[#allocation10 + $0xb8] sm:$0xff] }
  0xde   :  { %999 = vmatprep.subr.bf16.mxu1 %v3654_v43  ;;  %v3609_v43 = vcombine.low %v145_v32, %v149_v33  ;;  %v3618_v47 = vcombine.high %v153_v38, %v157_v39  ;;  %v249_v33 = vld [vmem:[#allocation10 + $0x398] sm:$0xff] }
  0xdf   :  { %2727 = vmatpush1.bf16.msra.mxu0 %v4127_v9 }
  0xe0   :  { %2728 = vmatprep.subr.bf16.mxu0 %v4135_v11  ;;  %v213_v11 = vld [vmem:[#allocation10 + $0x278] sm:$0xff] }
  0xe1   :  { %1000 = vmatpush1.bf16.msra.mxu1 %v3653_v45  ;;  %v165_v45 = vld [vmem:[#allocation10 + $0xf8] sm:$0xff] }
  0xe2   :  { %1001 = vmatprep.subr.bf16.mxu1 %v3662_v49  ;;  %v3617_v49 = vcombine.low %v153_v38, %v157_v39  ;;  %v3626_v53 = vcombine.high %v161_v44, %v165_v45  ;;  %v3625_v54 = vcombine.low %v161_v44, %v165_v45  ;;  %v257_v38 = vld [vmem:[#allocation10 + $0x3d8] sm:$0xff] }
  0xe3   :  { %2729 = vmatpush1.bf16.msra.mxu0 %v4133_v15  ;;  %v261_v39 = vld [vmem:[#allocation10 + $0x3f8] sm:$0xff] }
  0xe4   :  { %2730 = vmatprep.subr.bf16.mxu0 %v4141_v17  ;;  %v221_v17 = vld [vmem:[#allocation10 + $0x2b8] sm:$0xff] }
  0xe5   :  { %1002 = vmatpush1.bf16.msra.mxu1 %v3661_v51  ;;  %v173_v51 = vld [vmem:[#allocation10 + $0x138] sm:$0xff] }
  0xe6   :  { %1003 = vmatprep.subr.bf16.mxu1 %v3670_v55  ;;  %v177_v55 = vld [vmem:[#allocation10 + $0x158] sm:$0xff] }
  0xe7   :  { %2731 = vmatpush1.bf16.msra.mxu0 %v4139_v23  ;;  %v3642_v61 = vcombine.high %v177_v55, %v181_v57  ;;  %v4094_v44 = vld [vmem:[#allocation11 + $0x8] ss:$16 sps:$4 sm:$0xff]   ;;  %v4102_v45 = vld [vmem:[#allocation11 + $0x2c] ss:$16 sps:$4 sm:$0xff]  }
  0xe8   :  { %2732 = vmatprep.subr.bf16.mxu0 %v4147_v24 }
  0xe9   :  { %1004 = vmatpush1.bf16.msra.mxu1 %v3669_v58  ;;  %v3633_v58 = vcombine.low %v169_v50, %v173_v51 }
  0xea   :  { %1005 = vmatprep.subr.bf16.mxu1 %v3678_v62  ;;  %v3641_v62 = vcombine.low %v177_v55, %v181_v57  ;;  %v4130_v55 = vld [vmem:[#allocation11 + $0xc8] ss:$16 sps:$4 sm:$0xff]   ;;  %v4138_v57 = vld [vmem:[#allocation11 + $0xec] ss:$16 sps:$4 sm:$0xff]  }
  0xeb   :  { %2733 = vmatpush1.bf16.msra.mxu0 %v4145_v28 }
  0xec   :  { %2734 = vmatprep.subr.bf16.mxu0 %v4153_v30  ;;  %v245_v30 = vld [vmem:[#allocation10 + $0x378] sm:$0xff] }
  0xed   :  { %1006 = vmatpush1.bf16.msra.mxu1 %v3677_v0  ;;  %v197_v0 = vld [vmem:[#allocation10 + $0x1f8] sm:$0xff] }
  0xee   :  { %1007 = vmatprep.subr.bf16.mxu1 %v3686_v4  ;;  %v201_v4 = vld [vmem:[#allocation10 + $0x218] sm:$0xff]  ;;  %v3658_v7 = vcombine.high %v193_v63, %v197_v0  ;;  %v3657_v9 = vcombine.low %v193_v63, %v197_v0 }
  0xef   :  { %2735 = vmatpush1.bf16.msra.mxu0 %v4151_v34  ;;  %v3666_v13 = vcombine.high %v201_v4, %v205_v5  ;;  %v3665_v15 = vcombine.low %v201_v4, %v205_v5  ;;  %v253_v34 = vld [vmem:[#allocation10 + $0x3b8] sm:$0xff] }
  0xf0   :  { %2736 = vmatprep.subr.bf16.mxu0 %v4159_v36  ;;  %v4154_v63 = vld [vmem:[#allocation11 + $0x148] ss:$16 sps:$4 sm:$0xff]   ;;  %v4162_v0 = vld [vmem:[#allocation11 + $0x16c] ss:$16 sps:$4 sm:$0xff]  }
  0xf1   :  { %1008 = vmatpush1.bf16.msra.mxu1 %v3685_v6  ;;  %v4175_v6 = vld [vmem:[#allocation11 + $0x1c0] ss:$16 sps:$4 sm:$0xff]   ;;  %v4174_v4 = vld [vmem:[#allocation11 + $0x1ac] ss:$16 sps:$4 sm:$0xff]   ;;  %v4172_v5 = vld [vmem:[#allocation11 + $0x1a8] ss:$16 sps:$4 sm:$0xff]  }
  0xf2   :  { %1009 = vmatprep.subr.bf16.mxu1 %v3694_v10  ;;  %v209_v10 = vld [vmem:[#allocation10 + $0x258] sm:$0xff] }
  0xf3   :  { %2737 = vmatpush1.bf16.msra.mxu0 %v4157_v40  ;;  %v3673_v20 = vcombine.low %v209_v10, %v213_v11  ;;  %v3713_v40 = vcombine.low %v249_v33, %v253_v34 }
  0xf4   :  { %2738 = vmatprep.subr.bf16.mxu0 %v4165_v42  ;;  %v3721_v42 = vcombine.low %v257_v38, %v261_v39 }
  0xf5   :  { %1010 = vmatpush1.bf16.msra.mxu1 %v3693_v12  ;;  %v4181_v12 = vld [vmem:[#allocation11 + $0x1e0] ss:$16 sps:$4 sm:$0xff]  }
  0xf6   :  { %1011 = vmatprep.subr.bf16.mxu1 %v3702_v16  ;;  %v217_v16 = vld [vmem:[#allocation10 + $0x298] sm:$0xff] }
  0xf7   :  { %2739 = vmatpush1.bf16.msra.mxu0 %v4163_v46  ;;  %v3682_v23 = vcombine.high %v217_v16, %v221_v17  ;;  %v3681_v24 = vcombine.low %v217_v16, %v221_v17  ;;  %v4100_v46 = vld [vmem:[#allocation11 + $0x28] ss:$16 sps:$4 sm:$0xff]  }
  0xf8   :  { %2740 = vmatprep.subr.bf16.mxu0 %v4171_v48  ;;  %v4106_v48 = vld [vmem:[#allocation11 + $0x48] ss:$16 sps:$4 sm:$0xff]  }
  0xf9   :  { %1012 = vmatpush1.bf16.msra.mxu1 %v3701_v18  ;;  %v3674_v18 = vcombine.high %v209_v10, %v213_v11  ;;  %v4192_v10 = vld [vmem:[#allocation11 + $0x20c] ss:$16 sps:$4 sm:$0xff]   ;;  %v264_v11 = vlaneseq }
  0xfa   :  { %1013 = vmatprep.subr.bf16.mxu1 %v3710_v22  ;;  %v229_v22 = vld [vmem:[#allocation10 + $0x2f8] sm:$0xff] }
  0xfb   :  { %2741 = vmatpush1.bf16.msra.mxu0 %v4169_v52  ;;  %v3690_v27 = vcombine.high %v225_v21, %v229_v22  ;;  %v3689_v28 = vcombine.low %v225_v21, %v229_v22  ;;  %v4118_v52 = vld [vmem:[#allocation11 + $0x88] ss:$16 sps:$4 sm:$0xff]  }
  0xfc   :  { %2742 = vmatprep.subr.bf16.mxu0 %v4177_v2  ;;  %v4168_v2 = vld [vmem:[#allocation11 + $0x18c] ss:$16 sps:$4 sm:$0xff]  }
  0xfd   :  { %1014 = vmatpush1.bf16.msra.mxu1 %v3709_v25  ;;  %v233_v25 = vld [vmem:[#allocation10 + $0x318] sm:$0xff] }
  0xfe   :  { %1015 = vmatprep.subr.bf16.mxu1 %v3718_v29  ;;  %v241_v29 = vld [vmem:[#allocation10 + $0x358] sm:$0xff]  ;;  %v3697_v32 = vcombine.low %v233_v25, %v237_v26 }
  0xff   :  { %2743 = vmatpush1.bf16.msra.mxu0 %v4175_v6  ;;  %v3705_v36 = vcombine.low %v241_v29, %v245_v30  ;;  %v4180_v6 = vld [vmem:[#allocation11 + $0x1cc] ss:$16 sps:$4 sm:$0xff]  }
 0x100   :  { %2744 = vmatprep.subr.bf16.mxu0 %v4183_v8  ;;  %v4186_v8 = vld [vmem:[#allocation11 + $0x1ec] ss:$16 sps:$4 sm:$0xff]  }
 0x101   :  { %1016 = vmatpush1.bf16.msra.mxu1 %v3717_v31  ;;  %v3698_v31 = vcombine.high %v233_v25, %v237_v26  ;;  %v1132_v25 = vld [vmem:[#allocation5] sm:$0xff] }
 0x102   :  { %1067 = vmatprep.subr.bf16.mxu1 %v3602_v35  ;;  %v3706_v35 = vcombine.high %v241_v29, %v245_v30 }
 0x103   :  { %2745 = vmatpush1.bf16.msra.mxu0 %v4181_v12  ;;  %v4914_v12 = vshrl.u32 %v264_v11, 7  ;;  %v4244_v11 = vld [vmem:[#allocation11 + $0x328] ss:$16 sps:$4 sm:$0xff]  }
 0x104   :  { %1018 = vmatmul.mubr.bf16.vlgmr.msra.gmra.mrb[4].mxu1 %v4906_v56  ;;  %2755 = vmatprep.subr.bf16.mxu0 %v4189_v14  ;;  %v4922_v14 = vld [vmem:[%s4992_s5] sm:$0xff] }
 0x105   :  { %1068 = vmatpush1.bf16.msra.mxu1 %v3601_v37  ;;  %1099 = vmatprep.mubr.bf16.mxu1 %v4902_v19  ;;  %v3634_v19 = vcombine.high %v169_v50, %v173_v51  ;;  %v3714_v37 = vcombine.high %v249_v33, %v253_v34  ;;  %v4112_v50 = vld [vmem:[#allocation11 + $0x68] ss:$16 sps:$4 sm:$0xff]   ;;  %v4120_v51 = vld [vmem:[#allocation11 + $0x8c] ss:$16 sps:$4 sm:$0xff]   ;;  %v4187_v34 = vld [vmem:[#allocation11 + $0x200] ss:$16 sps:$4 sm:$0xff]  }
 0x106   :  { %1069 = vmatprep.subr.bf16.mxu1 %v3610_v41  ;;  %v3722_v41 = vcombine.high %v257_v38, %v261_v39  ;;  %v4198_v38 = vld [vmem:[#allocation11 + $0x22c] ss:$16 sps:$4 sm:$0xff]   ;;  %v4193_v39 = vld [vmem:[#allocation11 + $0x220] ss:$16 sps:$4 sm:$0xff]  }
 0x109   :  { %1070 = vmatpush1.bf16.msra.mxu1 %v3609_v43  ;;  %v4096_v43 = vld [vmem:[#allocation11 + $0xc] ss:$16 sps:$4 sm:$0xff]  }
 0x10a   :  { %1071 = vmatprep.subr.bf16.mxu1 %v3618_v47  ;;  %v4108_v47 = vld [vmem:[#allocation11 + $0x4c] ss:$16 sps:$4 sm:$0xff]  }
 0x10d   :  { %1072 = vmatpush1.bf16.msra.mxu1 %v3617_v49  ;;  %v4114_v49 = vld [vmem:[#allocation11 + $0x6c] ss:$16 sps:$4 sm:$0xff]  }
 0x10e   :  { %1073 = vmatprep.subr.bf16.mxu1 %v3626_v53  ;;  %v4126_v53 = vld [vmem:[#allocation11 + $0xac] ss:$16 sps:$4 sm:$0xff]  }
 0x111   :  { %1074 = vmatpush1.bf16.msra.mxu1 %v3625_v54  ;;  %v4124_v54 = vld [vmem:[#allocation11 + $0xa8] ss:$16 sps:$4 sm:$0xff]  }
 0x112   :  { %1075 = vmatprep.subr.bf16.mxu1 %v3634_v19  ;;  %v4136_v19 = vld [vmem:[#allocation11 + $0xe8] ss:$16 sps:$4 sm:$0xff]  }
 0x115   :  { %1076 = vmatpush1.bf16.msra.mxu1 %v3633_v58  ;;  %v4144_v58 = vld [vmem:[#allocation11 + $0x10c] ss:$16 sps:$4 sm:$0xff]  }
 0x116   :  { %1077 = vmatprep.subr.bf16.mxu1 %v3642_v61  ;;  %v4148_v61 = vld [vmem:[#allocation11 + $0x128] ss:$16 sps:$4 sm:$0xff]  }
 0x119   :  { %1078 = vmatpush1.bf16.msra.mxu1 %v3641_v62  ;;  %v4156_v62 = vld [vmem:[#allocation11 + $0x14c] ss:$16 sps:$4 sm:$0xff]  }
 0x11a   :  { %1079 = vmatprep.subr.bf16.mxu1 %v3650_v1  ;;  %v4160_v1 = vld [vmem:[#allocation11 + $0x168] ss:$16 sps:$4 sm:$0xff]  }
 0x11d   :  { %1080 = vmatpush1.bf16.msra.mxu1 %v3649_v3  ;;  %v4166_v3 = vld [vmem:[#allocation11 + $0x188] ss:$16 sps:$4 sm:$0xff]  }
 0x11e   :  { %1081 = vmatprep.subr.bf16.mxu1 %v3658_v7  ;;  %v4178_v7 = vld [vmem:[#allocation11 + $0x1c8] ss:$16 sps:$4 sm:$0xff]  }
 0x121   :  { %1082 = vmatpush1.bf16.msra.mxu1 %v3657_v9  ;;  %v4184_v9 = vld [vmem:[#allocation11 + $0x1e8] ss:$16 sps:$4 sm:$0xff]  }
 0x122   :  { %1083 = vmatprep.subr.bf16.mxu1 %v3666_v13  ;;  %v4917_v13 = vsub.s32 0, %v4914_v12 }
 0x124   :  { %v267_v16 = vrot.slane %v4922_v14, %v4917_v13 }
 0x125   :  { %1084 = vmatpush1.bf16.msra.mxu1 %v3665_v15  ;;  %v4925_v15 = vsub.s32 1, %v4914_v12 }
 0x126   :  { %1085 = vmatprep.subr.bf16.mxu1 %v3674_v18 }
 0x127   :  { %v271_v17 = vrot.slane %v4922_v14, %v4925_v15 }
 0x129   :  { %1086 = vmatpush1.bf16.msra.mxu1 %v3673_v20 }
 0x12a   :  { %1087 = vmatprep.subr.bf16.mxu1 %v3682_v23 }
 0x12d   :  { %1088 = vmatpush1.bf16.msra.mxu1 %v3681_v24 }
 0x12e   :  { %1089 = vmatprep.subr.bf16.mxu1 %v3690_v27 }
 0x131   :  { %1090 = vmatpush1.bf16.msra.mxu1 %v3689_v28  ;;  %v1133_v28 = vld [vmem:[#allocation5 + $0x8] sm:$0xff] }
 0x132   :  { %1091 = vmatprep.subr.bf16.mxu1 %v3698_v31 }
 0x135   :  { %1092 = vmatpush1.bf16.msra.mxu1 %v3697_v32 }
 0x136   :  { %1093 = vmatprep.subr.bf16.mxu1 %v3706_v35  ;;  %v4190_v35 = vld [vmem:[#allocation11 + $0x208] ss:$16 sps:$4 sm:$0xff]  }
 0x139   :  { %1094 = vmatpush1.bf16.msra.mxu1 %v3705_v36 }
 0x13a   :  { %1095 = vmatprep.subr.bf16.mxu1 %v3714_v37  ;;  %v4195_v37 = vld [vmem:[#allocation11 + $0x224] ss:$16 sps:$4 sm:$0xff]  }
 0x13d   :  { %1096 = vmatpush1.bf16.msra.mxu1 %v3713_v40  ;;  %v4196_v40 = vld [vmem:[#allocation11 + $0x228] ss:$16 sps:$4 sm:$0xff]  }
 0x13e   :  { %1097 = vmatprep.subr.bf16.mxu1 %v3722_v41  ;;  %v4201_v41 = vld [vmem:[#allocation11 + $0x244] ss:$16 sps:$4 sm:$0xff]  }
 0x141   :  { %1098 = vmatpush1.bf16.msra.mxu1 %v3721_v42  ;;  %v4204_v42 = vld [vmem:[#allocation11 + $0x24c] ss:$16 sps:$4 sm:$0xff]  }
 0x142   :  { %2878 = vmatprep.subr.bf16.mxu1 %v4096_v43  ;;  %v4199_v43 = vld [vmem:[#allocation11 + $0x240] ss:$16 sps:$4 sm:$0xff]  }
 0x144   :  { %1100 = vmatmul.mubr.bf16.vlgmr.msra.gmra.mrb[8].mxu1 %v4906_v56  ;;  %v4132_v56 = vld [vmem:[#allocation11 + $0xcc] ss:$16 sps:$4 sm:$0xff]  }
 0x145   :  { %2879 = vmatpush1.bf16.msra.mxu1 %v4094_v44  ;;  %v4202_v44 = vld [vmem:[#allocation11 + $0x248] ss:$16 sps:$4 sm:$0xff]  }
 0x146   :  { %2880 = vmatprep.subr.bf16.mxu1 %v4102_v45  ;;  %v4207_v45 = vld [vmem:[#allocation11 + $0x264] ss:$16 sps:$4 sm:$0xff]  }
 0x149   :  { %2881 = vmatpush1.bf16.msra.mxu1 %v4100_v46  ;;  %v4210_v46 = vld [vmem:[#allocation11 + $0x26c] ss:$16 sps:$4 sm:$0xff]  }
 0x14a   :  { %2882 = vmatprep.subr.bf16.mxu1 %v4108_v47  ;;  %v4205_v47 = vld [vmem:[#allocation11 + $0x260] ss:$16 sps:$4 sm:$0xff]  }
 0x14d   :  { %2883 = vmatpush1.bf16.msra.mxu1 %v4106_v48  ;;  %v4208_v48 = vld [vmem:[#allocation11 + $0x268] ss:$16 sps:$4 sm:$0xff]  }
 0x14e   :  { %2884 = vmatprep.subr.bf16.mxu1 %v4114_v49  ;;  %v4213_v49 = vld [vmem:[#allocation11 + $0x284] ss:$16 sps:$4 sm:$0xff]  }
 0x151   :  { %2885 = vmatpush1.bf16.msra.mxu1 %v4112_v50  ;;  %v4216_v50 = vld [vmem:[#allocation11 + $0x28c] ss:$16 sps:$4 sm:$0xff]  }
 0x152   :  { %2886 = vmatprep.subr.bf16.mxu1 %v4120_v51 }
 0x155   :  { %2887 = vmatpush1.bf16.msra.mxu1 %v4118_v52 }
 0x156   :  { %2888 = vmatprep.subr.bf16.mxu1 %v4126_v53 }
 0x159   :  { %2889 = vmatpush1.bf16.msra.mxu1 %v4124_v54  ;;  %v4211_v54 = vld [vmem:[#allocation11 + $0x280] ss:$16 sps:$4 sm:$0xff]  }
 0x15a   :  { %2890 = vmatprep.subr.bf16.mxu1 %v4132_v56  ;;  %v4214_v56 = vld [vmem:[#allocation11 + $0x288] ss:$16 sps:$4 sm:$0xff]  }
 0x15d   :  { %2891 = vmatpush1.bf16.msra.mxu1 %v4130_v55 }
 0x15e   :  { %2892 = vmatprep.subr.bf16.mxu1 %v4138_v57  ;;  %v4219_v57 = vld [vmem:[#allocation11 + $0x2a4] ss:$16 sps:$4 sm:$0xff]  }
 0x161   :  { %2893 = vmatpush1.bf16.msra.mxu1 %v4136_v19  ;;  %v4222_v19 = vld [vmem:[#allocation11 + $0x2ac] ss:$16 sps:$4 sm:$0xff]  }
 0x162   :  { %2894 = vmatprep.subr.bf16.mxu1 %v4144_v58  ;;  %v4217_v58 = vld [vmem:[#allocation11 + $0x2a0] ss:$16 sps:$4 sm:$0xff]  }
 0x165   :  { %2895 = vmatpush1.bf16.msra.mxu1 %v4142_v59  ;;  %v4220_v59 = vld [vmem:[#allocation11 + $0x2a8] ss:$16 sps:$4 sm:$0xff]  }
 0x166   :  { %2896 = vmatprep.subr.bf16.mxu1 %v4150_v60  ;;  %v4225_v60 = vld [vmem:[#allocation11 + $0x2c4] ss:$16 sps:$4 sm:$0xff]  }
 0x169   :  { %2897 = vmatpush1.bf16.msra.mxu1 %v4148_v61  ;;  %v4228_v61 = vld [vmem:[#allocation11 + $0x2cc] ss:$16 sps:$4 sm:$0xff]  }
 0x16a   :  { %2898 = vmatprep.subr.bf16.mxu1 %v4156_v62  ;;  %v4223_v62 = vld [vmem:[#allocation11 + $0x2c0] ss:$16 sps:$4 sm:$0xff]  }
 0x16d   :  { %2899 = vmatpush1.bf16.msra.mxu1 %v4154_v63  ;;  %v4226_v63 = vld [vmem:[#allocation11 + $0x2c8] ss:$16 sps:$4 sm:$0xff]  }
 0x16e   :  { %2900 = vmatprep.subr.bf16.mxu1 %v4162_v0  ;;  %v4231_v0 = vld [vmem:[#allocation11 + $0x2e4] ss:$16 sps:$4 sm:$0xff]  }
 0x171   :  { %2901 = vmatpush1.bf16.msra.mxu1 %v4160_v1  ;;  %v4234_v1 = vld [vmem:[#allocation11 + $0x2ec] ss:$16 sps:$4 sm:$0xff]  }
 0x172   :  { %2902 = vmatprep.subr.bf16.mxu1 %v4168_v2  ;;  %v4229_v2 = vld [vmem:[#allocation11 + $0x2e0] ss:$16 sps:$4 sm:$0xff]  }
 0x175   :  { %2903 = vmatpush1.bf16.msra.mxu1 %v4166_v3  ;;  %v4232_v3 = vld [vmem:[#allocation11 + $0x2e8] ss:$16 sps:$4 sm:$0xff]  }
 0x176   :  { %2904 = vmatprep.subr.bf16.mxu1 %v4174_v4  ;;  %v4237_v4 = vld [vmem:[#allocation11 + $0x304] ss:$16 sps:$4 sm:$0xff]  }
 0x179   :  { %2905 = vmatpush1.bf16.msra.mxu1 %v4172_v5  ;;  %v4240_v5 = vld [vmem:[#allocation11 + $0x30c] ss:$16 sps:$4 sm:$0xff]  }
 0x17a   :  { %2906 = vmatprep.subr.bf16.mxu1 %v4180_v6  ;;  %v4235_v6 = vld [vmem:[#allocation11 + $0x300] ss:$16 sps:$4 sm:$0xff]  }
 0x17d   :  { %2907 = vmatpush1.bf16.msra.mxu1 %v4178_v7  ;;  %v4238_v7 = vld [vmem:[#allocation11 + $0x308] ss:$16 sps:$4 sm:$0xff]  }
 0x17e   :  { %2908 = vmatprep.subr.bf16.mxu1 %v4186_v8  ;;  %v4243_v8 = vld [vmem:[#allocation11 + $0x324] ss:$16 sps:$4 sm:$0xff]  }
 0x181   :  { %2909 = vmatpush1.bf16.msra.mxu1 %v4184_v9  ;;  %v4246_v9 = vld [vmem:[#allocation11 + $0x32c] ss:$16 sps:$4 sm:$0xff]  }
 0x182   :  { %2919 = vmatprep.subr.bf16.mxu1 %v4192_v10  ;;  %v4241_v10 = vld [vmem:[#allocation11 + $0x320] ss:$16 sps:$4 sm:$0xff]  }
 0x197   :  { %v978_v18 = vpop.f32.mrb[0].mxu1 }
 0x198   :  { %v979_v20 = vadd.f32 %v978_v18, %v267_v16  ;;  %v980_v21 = vpop.f32.mrb[1].mxu1  ;;  %v4249_v16 = vld [vmem:[#allocation11 + $0x344] ss:$16 sps:$4 sm:$0xff]   ;;  %v4247_v18 = vld [vmem:[#allocation11 + $0x340] ss:$16 sps:$4 sm:$0xff]  }
 0x199   :  { %v981_v22 = vadd.f32 %v980_v21, %v271_v17  ;;  %v982_v23 = vpop.f32.mrb[2].mxu1  ;;  %v4931_v51 = vpop.f32.mrb[0].mxu0  ;;  %v4252_v17 = vld [vmem:[#allocation11 + $0x34c] ss:$16 sps:$4 sm:$0xff]   ;;  %v4255_v21 = vld [vmem:[#allocation11 + $0x364] ss:$16 sps:$4 sm:$0xff]  }
 0x19a   :  { %vm1108_vm0 = vcmp.ge.f32.partialorder %v979_v20, 0.0  ;;  %v1116_v24 = vmul.f32 0.2, %v979_v20  ;;  %v983_v26 = vpop.f32.mrb[3].mxu1  ;;  %v4933_v52 = vpop.f32.mrb[1].mxu0  ;;  %v286_v23 = vsub.s32 5, %v4914_v12 }
 0x19b   :  { %vm1109_vm1 = vcmp.ge.f32.partialorder %v981_v22, 0.0  ;;  %v1117_v27 = vmul.f32 0.2, %v981_v22  ;;  %v1064_v53 = vpop.f32.mrb[2].mxu0  ;;  %v4261_v26 = vld [vmem:[#allocation11 + $0x384] ss:$16 sps:$4 sm:$0xff]  }
 0x19c   :  { %v1124_v29 = vsel %vm1108_vm0, %v979_v20, %v1116_v24  ;;  %v1065_v55 = vpop.f32.mrb[3].mxu0  ;;  %v4250_v20 = vld [vmem:[#allocation11 + $0x348] ss:$16 sps:$4 sm:$0xff]   ;;  %v4253_v24 = vld [vmem:[#allocation11 + $0x360] ss:$16 sps:$4 sm:$0xff]  }
 0x19d   :  { %v1140_v30 = vmul.f32 %v1132_v25, %v1124_v29  ;;  %v1125_v31 = vsel %vm1109_vm1, %v981_v22, %v1117_v27  ;;  %v4258_v22 = vld [vmem:[#allocation11 + $0x36c] ss:$16 sps:$4 sm:$0xff]   ;;  %v4256_v25 = vld [vmem:[#allocation11 + $0x368] ss:$16 sps:$4 sm:$0xff]   ;;  %v4259_v29 = vld [vmem:[#allocation11 + $0x380] ss:$16 sps:$4 sm:$0xff]  }
 0x19e   :  { %v1141_v32 = vmul.f32 %v1133_v28, %v1125_v31  ;;  %v4264_v27 = vld [vmem:[#allocation11 + $0x38c] ss:$16 sps:$4 sm:$0xff]   ;;  %v287_v28 = vrot.slane %v4922_v14, %v286_v23  ;;  %v274_v31 = vsub.s32 2, %v4914_v12 }
 0x19f   :  { %v1148_v36 = vpack.c.bf16 %v1140_v30, %v1140_v30  ;;  %v4262_v30 = vld [vmem:[#allocation11 + $0x388] ss:$16 sps:$4 sm:$0xff]   ;;  %v4306_v23 = vld [vmem:[#allocation11 + $0x46c] ss:$16 sps:$4 sm:$0xff]  }
 0x1a0   :  { %v1149_v33 = vpack.c.bf16 %v1141_v32, %v1141_v32  ;;  %v4267_v32 = vld [vmem:[#allocation11 + $0x3a4] ss:$16 sps:$4 sm:$0xff]  }
 0x1a2   :  { %2746 = vmatprep.mubr.bf16.mxu0 %v1149_v33  ;;  %2910 = vmatprep.mubr.bf16.mxu1 %v1149_v33  ;;  %v4270_v33 = vld [vmem:[#allocation11 + $0x3ac] ss:$16 sps:$4 sm:$0xff]  }
 0x1a3   :  { %2747 = vmatmul.mubr.bf16.vlgmr.msra.gmra.mrb[4].mxu0 %v1148_v36  ;;  %2911 = vmatmul.mubr.bf16.vlgmr.msra.gmra.mrb[12].mxu1 %v1148_v36  ;;  %v4265_v36 = vld [vmem:[#allocation11 + $0x3a0] ss:$16 sps:$4 sm:$0xff]  }
 0x1a4   :  { %2756 = vmatpush1.bf16.msra.mxu0 %v4187_v34  ;;  %2920 = vmatpush1.bf16.msra.mxu1 %v4190_v35  ;;  %v278_v34 = vsub.s32 3, %v4914_v12  ;;  %v1063_v35 = vadd.f32 %v4933_v52, %v287_v28  ;;  %v4282_v52 = vld [vmem:[#allocation11 + $0x3ec] ss:$16 sps:$4 sm:$0xff]   ;;  %v4307_v28 = vld [vmem:[#allocation11 + $0x480] ss:$16 sps:$4 sm:$0xff]  }
 0x1a5   :  { %2757 = vmatprep.subr.bf16.mxu0 %v4195_v37  ;;  %2921 = vmatprep.subr.bf16.mxu1 %v4198_v38  ;;  %v4268_v37 = vld [vmem:[#allocation11 + $0x3a8] ss:$16 sps:$4 sm:$0xff]   ;;  %v275_v38 = vrot.slane %v4922_v14, %v274_v31 }
 0x1a6   :  { %vm1113_vm2 = vcmp.ge.f32.partialorder %v1063_v35, 0.0 }
 0x1a8   :  { %2758 = vmatpush1.bf16.msra.mxu0 %v4193_v39  ;;  %2922 = vmatpush1.bf16.msra.mxu1 %v4196_v40  ;;  %v279_v39 = vrot.slane %v4922_v14, %v278_v34  ;;  %v4273_v40 = vld [vmem:[#allocation11 + $0x3c4] ss:$16 sps:$4 sm:$0xff]  }
 0x1a9   :  { %2759 = vmatprep.subr.bf16.mxu0 %v4201_v41  ;;  %2923 = vmatprep.subr.bf16.mxu1 %v4204_v42  ;;  %v4276_v41 = vld [vmem:[#allocation11 + $0x3cc] ss:$16 sps:$4 sm:$0xff]  }
 0x1ac   :  { %2760 = vmatpush1.bf16.msra.mxu0 %v4199_v43  ;;  %2924 = vmatpush1.bf16.msra.mxu1 %v4202_v44  ;;  %v1121_v43 = vmul.f32 0.2, %v1063_v35 }
 0x1ad   :  { %2761 = vmatprep.subr.bf16.mxu0 %v4207_v45  ;;  %2925 = vmatprep.subr.bf16.mxu1 %v4210_v46  ;;  %v4271_v46 = vld [vmem:[#allocation11 + $0x3c0] ss:$16 sps:$4 sm:$0xff]  }
 0x1b0   :  { %2762 = vmatpush1.bf16.msra.mxu0 %v4205_v47  ;;  %2926 = vmatpush1.bf16.msra.mxu1 %v4208_v48  ;;  %v4274_v47 = vld [vmem:[#allocation11 + $0x3c8] ss:$16 sps:$4 sm:$0xff]  }
 0x1b1   :  { %2763 = vmatprep.subr.bf16.mxu0 %v4213_v49  ;;  %2927 = vmatprep.subr.bf16.mxu1 %v4216_v50  ;;  %v4279_v50 = vld [vmem:[#allocation11 + $0x3e4] ss:$16 sps:$4 sm:$0xff]  }
 0x1b4   :  { %2764 = vmatpush1.bf16.msra.mxu0 %v4211_v54  ;;  %2928 = vmatpush1.bf16.msra.mxu1 %v4214_v56  ;;  %v1134_v54 = vld [vmem:[#allocation5 + $0x10] sm:$0xff] }
 0x1b5   :  { %2765 = vmatprep.subr.bf16.mxu0 %v4219_v57  ;;  %2929 = vmatprep.subr.bf16.mxu1 %v4222_v19  ;;  %v1135_v57 = vld [vmem:[#allocation5 + $0x18] sm:$0xff]  ;;  %v1129_v19 = vsel %vm1113_vm2, %v1063_v35, %v1121_v43 }
 0x1b6   :  { %v4316_v35 = vld [vmem:[#allocation11 + $0x4a8] ss:$16 sps:$4 sm:$0xff]  }
 0x1b7   :  { %v4328_v43 = vld [vmem:[#allocation11 + $0x4e8] ss:$16 sps:$4 sm:$0xff]  }
 0x1b8   :  { %2766 = vmatpush1.bf16.msra.mxu0 %v4217_v58  ;;  %2930 = vmatpush1.bf16.msra.mxu1 %v4220_v59  ;;  %v1137_v58 = vld [vmem:[#allocation5 + $0x28] sm:$0xff] }
 0x1b9   :  { %2767 = vmatprep.subr.bf16.mxu0 %v4225_v60  ;;  %2931 = vmatprep.subr.bf16.mxu1 %v4228_v61  ;;  %v4277_v60 = vld [vmem:[#allocation11 + $0x3e0] ss:$16 sps:$4 sm:$0xff]   ;;  %v4280_v61 = vld [vmem:[#allocation11 + $0x3e8] ss:$16 sps:$4 sm:$0xff]  }
 0x1bc   :  { %2768 = vmatpush1.bf16.msra.mxu0 %v4223_v62  ;;  %2932 = vmatpush1.bf16.msra.mxu1 %v4226_v63 }
 0x1bd   :  { %2769 = vmatprep.subr.bf16.mxu0 %v4231_v0  ;;  %2933 = vmatprep.subr.bf16.mxu1 %v4234_v1  ;;  %v4285_v0 = vld [vmem:[#allocation11 + $0x404] ss:$16 sps:$4 sm:$0xff]   ;;  %v4288_v1 = vld [vmem:[#allocation11 + $0x40c] ss:$16 sps:$4 sm:$0xff]  }
 0x1c0   :  { %2770 = vmatpush1.bf16.msra.mxu0 %v4229_v2  ;;  %2934 = vmatpush1.bf16.msra.mxu1 %v4232_v3  ;;  %v1145_v3 = vmul.f32 %v1137_v58, %v1129_v19  ;;  %v4354_v19 = vld [vmem:[#allocation11 + $0x56c] ss:$16 sps:$4 sm:$0xff]   ;;  %v282_v58 = vsub.s32 4, %v4914_v12 }
 0x1c1   :  { %2771 = vmatprep.subr.bf16.mxu0 %v4237_v4  ;;  %2935 = vmatprep.subr.bf16.mxu1 %v4240_v5  ;;  %v4283_v5 = vld [vmem:[#allocation11 + $0x400] ss:$16 sps:$4 sm:$0xff]  }
 0x1c4   :  { %2772 = vmatpush1.bf16.msra.mxu0 %v4235_v6  ;;  %2936 = vmatpush1.bf16.msra.mxu1 %v4238_v7  ;;  %v4286_v6 = vld [vmem:[#allocation11 + $0x408] ss:$16 sps:$4 sm:$0xff]  }
 0x1c5   :  { %2773 = vmatprep.subr.bf16.mxu0 %v4243_v8  ;;  %2937 = vmatprep.subr.bf16.mxu1 %v4246_v9  ;;  %v4291_v8 = vld [vmem:[#allocation11 + $0x424] ss:$16 sps:$4 sm:$0xff]   ;;  %v4294_v9 = vld [vmem:[#allocation11 + $0x42c] ss:$16 sps:$4 sm:$0xff]  }
 0x1c8   :  { %2774 = vmatpush1.bf16.msra.mxu0 %v4241_v10  ;;  %2938 = vmatpush1.bf16.msra.mxu1 %v4244_v11  ;;  %v1153_v10 = vpack.c.bf16 %v1145_v3, %v1145_v3  ;;  %v4289_v11 = vld [vmem:[#allocation11 + $0x420] ss:$16 sps:$4 sm:$0xff]   ;;  %v4366_v3 = vld [vmem:[#allocation11 + $0x5ac] ss:$16 sps:$4 sm:$0xff]  }
 0x1c9   :  { %2775 = vmatprep.subr.bf16.mxu0 %v4249_v16  ;;  %2939 = vmatprep.subr.bf16.mxu1 %v4252_v17  ;;  %v4292_v16 = vld [vmem:[#allocation11 + $0x428] ss:$16 sps:$4 sm:$0xff]   ;;  %v4297_v17 = vld [vmem:[#allocation11 + $0x444] ss:$16 sps:$4 sm:$0xff]  }
 0x1cc   :  { %2776 = vmatpush1.bf16.msra.mxu0 %v4247_v18  ;;  %2940 = vmatpush1.bf16.msra.mxu1 %v4250_v20  ;;  %v4300_v18 = vld [vmem:[#allocation11 + $0x44c] ss:$16 sps:$4 sm:$0xff]   ;;  %v4295_v20 = vld [vmem:[#allocation11 + $0x440] ss:$16 sps:$4 sm:$0xff]  }
 0x1cd   :  { %2777 = vmatprep.subr.bf16.mxu0 %v4255_v21  ;;  %2941 = vmatprep.subr.bf16.mxu1 %v4258_v22  ;;  %v4298_v21 = vld [vmem:[#allocation11 + $0x448] ss:$16 sps:$4 sm:$0xff]   ;;  %v4303_v22 = vld [vmem:[#allocation11 + $0x464] ss:$16 sps:$4 sm:$0xff]  }
 0x1d0   :  { %2778 = vmatpush1.bf16.msra.mxu0 %v4253_v24  ;;  %2942 = vmatpush1.bf16.msra.mxu1 %v4256_v25  ;;  %v4301_v24 = vld [vmem:[#allocation11 + $0x460] ss:$16 sps:$4 sm:$0xff]   ;;  %v4304_v25 = vld [vmem:[#allocation11 + $0x468] ss:$16 sps:$4 sm:$0xff]  }
 0x1d1   :  { %2779 = vmatprep.subr.bf16.mxu0 %v4261_v26  ;;  %2943 = vmatprep.subr.bf16.mxu1 %v4264_v27  ;;  %v4309_v26 = vld [vmem:[#allocation11 + $0x484] ss:$16 sps:$4 sm:$0xff]   ;;  %v4312_v27 = vld [vmem:[#allocation11 + $0x48c] ss:$16 sps:$4 sm:$0xff]  }
 0x1d4   :  { %2780 = vmatpush1.bf16.msra.mxu0 %v4259_v29  ;;  %2944 = vmatpush1.bf16.msra.mxu1 %v4262_v30  ;;  %v4310_v29 = vld [vmem:[#allocation11 + $0x488] ss:$16 sps:$4 sm:$0xff]   ;;  %v4315_v30 = vld [vmem:[#allocation11 + $0x4a4] ss:$16 sps:$4 sm:$0xff]  }
 0x1d5   :  { %2781 = vmatprep.subr.bf16.mxu0 %v4267_v32  ;;  %2945 = vmatprep.subr.bf16.mxu1 %v4270_v33  ;;  %v4318_v32 = vld [vmem:[#allocation11 + $0x4ac] ss:$16 sps:$4 sm:$0xff]   ;;  %v4313_v33 = vld [vmem:[#allocation11 + $0x4a0] ss:$16 sps:$4 sm:$0xff]  }
 0x1d7   :  { %v1019_v42 = vpop.f32.mrb[4].mxu1 }
 0x1d8   :  { %v1020_v44 = vadd.f32 %v1019_v42, %v275_v38  ;;  %2782 = vmatpush1.bf16.msra.mxu0 %v4265_v36  ;;  %2946 = vmatpush1.bf16.msra.mxu1 %v4268_v37  ;;  %v1021_v45 = vpop.f32.mrb[5].mxu1  ;;  %v4321_v36 = vld [vmem:[#allocation11 + $0x4c4] ss:$16 sps:$4 sm:$0xff]   ;;  %v4324_v37 = vld [vmem:[#allocation11 + $0x4cc] ss:$16 sps:$4 sm:$0xff]  }
 0x1d9   :  { %v1022_v48 = vadd.f32 %v1021_v45, %v279_v39  ;;  %v1023_v49 = vpop.f32.mrb[6].mxu1  ;;  %2783 = vmatprep.subr.bf16.mxu0 %v4273_v40  ;;  %2947 = vmatprep.subr.bf16.mxu1 %v4276_v41  ;;  %v4319_v38 = vld [vmem:[#allocation11 + $0x4c0] ss:$16 sps:$4 sm:$0xff]   ;;  %v4322_v39 = vld [vmem:[#allocation11 + $0x4c8] ss:$16 sps:$4 sm:$0xff]  }
 0x1da   :  { %vm1110_vm3 = vcmp.ge.f32.partialorder %v1020_v44, 0.0  ;;  %v1118_v53 = vmul.f32 0.2, %v1020_v44  ;;  %v1024_v56 = vpop.f32.mrb[7].mxu1  ;;  %v4327_v40 = vld [vmem:[#allocation11 + $0x4e4] ss:$16 sps:$4 sm:$0xff]  }
 0x1db   :  { %vm1111_vm4 = vcmp.ge.f32.partialorder %v1022_v48, 0.0  ;;  %v1119_v55 = vmul.f32 0.2, %v1022_v48  ;;  %v4330_v41 = vld [vmem:[#allocation11 + $0x4ec] ss:$16 sps:$4 sm:$0xff]  }
 0x1dc   :  { %v1126_v59 = vsel %vm1110_vm3, %v1020_v44, %v1118_v53  ;;  %2784 = vmatpush1.bf16.msra.mxu0 %v4271_v46  ;;  %2948 = vmatpush1.bf16.msra.mxu1 %v4274_v47  ;;  %v4325_v42 = vld [vmem:[#allocation11 + $0x4e0] ss:$16 sps:$4 sm:$0xff]   ;;  %v4333_v44 = vld [vmem:[#allocation11 + $0x504] ss:$16 sps:$4 sm:$0xff]   ;;  %v4336_v45 = vld [vmem:[#allocation11 + $0x50c] ss:$16 sps:$4 sm:$0xff]  }
 0x1dd   :  { %v1142_v62 = vmul.f32 %v1134_v54, %v1126_v59  ;;  %v1127_v63 = vsel %vm1111_vm4, %v1022_v48, %v1119_v55  ;;  %2785 = vmatprep.subr.bf16.mxu0 %v4279_v50  ;;  %2949 = vmatprep.subr.bf16.mxu1 %v4282_v52  ;;  %v4331_v46 = vld [vmem:[#allocation11 + $0x500] ss:$16 sps:$4 sm:$0xff]   ;;  %v4334_v47 = vld [vmem:[#allocation11 + $0x508] ss:$16 sps:$4 sm:$0xff]   ;;  %v4339_v48 = vld [vmem:[#allocation11 + $0x524] ss:$16 sps:$4 sm:$0xff]  }
 0x1de   :  { %v1143_v2 = vmul.f32 %v1135_v57, %v1127_v63  ;;  %v4342_v49 = vld [vmem:[#allocation11 + $0x52c] ss:$16 sps:$4 sm:$0xff]   ;;  %v4337_v50 = vld [vmem:[#allocation11 + $0x520] ss:$16 sps:$4 sm:$0xff]   ;;  %v4340_v52 = vld [vmem:[#allocation11 + $0x528] ss:$16 sps:$4 sm:$0xff]   ;;  %v283_v63 = vrot.slane %v4922_v14, %v282_v58 }
 0x1df   :  { %v1150_v7 = vpack.c.bf16 %v1142_v62, %v1142_v62  ;;  %v4345_v53 = vld [vmem:[#allocation11 + $0x544] ss:$16 sps:$4 sm:$0xff]   ;;  %v4348_v54 = vld [vmem:[#allocation11 + $0x54c] ss:$16 sps:$4 sm:$0xff]   ;;  %v4343_v56 = vld [vmem:[#allocation11 + $0x540] ss:$16 sps:$4 sm:$0xff]  }
 0x1e0   :  { %2786 = vmatpush1.bf16.msra.mxu0 %v4277_v60  ;;  %2950 = vmatpush1.bf16.msra.mxu1 %v4280_v61  ;;  %v1151_v4 = vpack.c.bf16 %v1143_v2, %v1143_v2  ;;  %v4346_v55 = vld [vmem:[#allocation11 + $0x548] ss:$16 sps:$4 sm:$0xff]   ;;  %v4351_v57 = vld [vmem:[#allocation11 + $0x564] ss:$16 sps:$4 sm:$0xff]   ;;  %v4349_v59 = vld [vmem:[#allocation11 + $0x560] ss:$16 sps:$4 sm:$0xff]  }
 0x1e1   :  { %2796 = vmatprep.subr.bf16.mxu0 %v4285_v0  ;;  %2960 = vmatprep.subr.bf16.mxu1 %v4288_v1  ;;  %v4352_v60 = vld [vmem:[#allocation11 + $0x568] ss:$16 sps:$4 sm:$0xff]   ;;  %v4357_v61 = vld [vmem:[#allocation11 + $0x584] ss:$16 sps:$4 sm:$0xff]   ;;  %v4360_v62 = vld [vmem:[#allocation11 + $0x58c] ss:$16 sps:$4 sm:$0xff]  }
 0x1e2   :  { %2787 = vmatprep.mubr.bf16.mxu0 %v1151_v4  ;;  %2951 = vmatprep.mubr.bf16.mxu1 %v1151_v4  ;;  %v4355_v0 = vld [vmem:[#allocation11 + $0x580] ss:$16 sps:$4 sm:$0xff]   ;;  %v4358_v1 = vld [vmem:[#allocation11 + $0x588] ss:$16 sps:$4 sm:$0xff]   ;;  %v4363_v2 = vld [vmem:[#allocation11 + $0x5a4] ss:$16 sps:$4 sm:$0xff]  }
 0x1e3   :  { %2788 = vmatmul.mubr.bf16.vlgmr.msra.gmra.mrb[4].mxu0 %v1150_v7  ;;  %2952 = vmatmul.mubr.bf16.vlgmr.msra.gmra.mrb[12].mxu1 %v1150_v7  ;;  %v294_v4 = vsub.s32 7, %v4914_v12  ;;  %v4364_v7 = vld [vmem:[#allocation11 + $0x5a8] ss:$16 sps:$4 sm:$0xff]   ;;  %v4411_v58 = vld [vmem:[#allocation11 + $0x6a4] ss:$16 sps:$4 sm:$0xff]  }
 0x1e4   :  { %2797 = vmatpush1.bf16.msra.mxu0 %v4283_v5  ;;  %2961 = vmatpush1.bf16.msra.mxu1 %v4286_v6  ;;  %v1061_v5 = vadd.f32 %v4931_v51, %v283_v63  ;;  %v4361_v6 = vld [vmem:[#allocation11 + $0x5a0] ss:$16 sps:$4 sm:$0xff]   ;;  %v4375_v51 = vld [vmem:[#allocation11 + $0x5e4] ss:$16 sps:$4 sm:$0xff]   ;;  %v4420_v63 = vld [vmem:[#allocation11 + $0x6cc] ss:$16 sps:$4 sm:$0xff]  }
 0x1e5   :  { %2798 = vmatprep.subr.bf16.mxu0 %v4291_v8  ;;  %2962 = vmatprep.subr.bf16.mxu1 %v4294_v9  ;;  %v4369_v8 = vld [vmem:[#allocation11 + $0x5c4] ss:$16 sps:$4 sm:$0xff]   ;;  %v4372_v9 = vld [vmem:[#allocation11 + $0x5cc] ss:$16 sps:$4 sm:$0xff]  }
 0x1e6   :  { %2828 = vmatprep.mubr.bf16.mxu0 %v1153_v10  ;;  %2992 = vmatprep.mubr.bf16.mxu1 %v1153_v10  ;;  %v295_v10 = vrot.slane %v4922_v14, %v294_v4  ;;  %vm1112_vm5 = vcmp.ge.f32.partialorder %v1061_v5, 0.0  ;;  %v4421_v4 = vld [vmem:[#allocation11 + $0x6e0] ss:$16 sps:$4 sm:$0xff]  }
 0x1e8   :  { %2799 = vmatpush1.bf16.msra.mxu0 %v4289_v11  ;;  %2963 = vmatpush1.bf16.msra.mxu1 %v4292_v16  ;;  %v1120_v11 = vmul.f32 0.2, %v1061_v5 }
 0x1e9   :  { %2800 = vmatprep.subr.bf16.mxu0 %v4297_v17  ;;  %2964 = vmatprep.subr.bf16.mxu1 %v4300_v18  ;;  %v4367_v17 = vld [vmem:[#allocation11 + $0x5c0] ss:$16 sps:$4 sm:$0xff]   ;;  %v4370_v18 = vld [vmem:[#allocation11 + $0x5c8] ss:$16 sps:$4 sm:$0xff]  }
 0x1ec   :  { %2801 = vmatpush1.bf16.msra.mxu0 %v4295_v20  ;;  %2965 = vmatpush1.bf16.msra.mxu1 %v4298_v21  ;;  %v4378_v21 = vld [vmem:[#allocation11 + $0x5ec] ss:$16 sps:$4 sm:$0xff]  }
 0x1ed   :  { %2802 = vmatprep.subr.bf16.mxu0 %v4303_v22  ;;  %2966 = vmatprep.subr.bf16.mxu1 %v4306_v23 }
 0x1f0   :  { %2803 = vmatpush1.bf16.msra.mxu0 %v4301_v24  ;;  %2967 = vmatpush1.bf16.msra.mxu1 %v4304_v25  ;;  %v1128_v24 = vsel %vm1112_vm5, %v1061_v5, %v1120_v11  ;;  %v1136_v25 = vld [vmem:[#allocation5 + $0x20] sm:$0xff]  ;;  %v4424_v5 = vld [vmem:[#allocation11 + $0x6e8] ss:$16 sps:$4 sm:$0xff]   ;;  %v4438_v11 = vld [vmem:[#allocation11 + $0x72c] ss:$16 sps:$4 sm:$0xff]  }
 0x1f1   :  { %2804 = vmatprep.subr.bf16.mxu0 %v4309_v26  ;;  %2968 = vmatprep.subr.bf16.mxu1 %v4312_v27 }
 0x1f4   :  { %2805 = vmatpush1.bf16.msra.mxu0 %v4307_v28  ;;  %2969 = vmatpush1.bf16.msra.mxu1 %v4310_v29  ;;  %v1139_v28 = vld [vmem:[#allocation5 + $0x38] sm:$0xff]  ;;  %v4373_v29 = vld [vmem:[#allocation11 + $0x5e0] ss:$16 sps:$4 sm:$0xff]  }
 0x1f5   :  { %2806 = vmatprep.subr.bf16.mxu0 %v4315_v30  ;;  %2970 = vmatprep.subr.bf16.mxu1 %v4318_v32  ;;  %v4376_v30 = vld [vmem:[#allocation11 + $0x5e8] ss:$16 sps:$4 sm:$0xff]   ;;  %v1144_v32 = vmul.f32 %v1136_v25, %v1128_v24  ;;  %v4450_v24 = vld [vmem:[#allocation11 + $0x76c] ss:$16 sps:$4 sm:$0xff]   ;;  %v290_v25 = vsub.s32 6, %v4914_v12  ;;  %v3056_v12 = vld [vmem:[#allocation7 + $0x10] sm:$0xff] }
 0x1f8   :  { %2807 = vmatpush1.bf16.msra.mxu0 %v4313_v33  ;;  %2971 = vmatpush1.bf16.msra.mxu1 %v4316_v35  ;;  %v4381_v33 = vld [vmem:[#allocation11 + $0x604] ss:$16 sps:$4 sm:$0xff]   ;;  %v4384_v35 = vld [vmem:[#allocation11 + $0x60c] ss:$16 sps:$4 sm:$0xff]  }
 0x1f9   :  { %2808 = vmatprep.subr.bf16.mxu0 %v4321_v36  ;;  %2972 = vmatprep.subr.bf16.mxu1 %v4324_v37 }
 0x1fc   :  { %2809 = vmatpush1.bf16.msra.mxu0 %v4319_v38  ;;  %2973 = vmatpush1.bf16.msra.mxu1 %v4322_v39  ;;  %v4379_v38 = vld [vmem:[#allocation11 + $0x600] ss:$16 sps:$4 sm:$0xff]   ;;  %v4382_v39 = vld [vmem:[#allocation11 + $0x608] ss:$16 sps:$4 sm:$0xff]  }
 0x1fd   :  { %2810 = vmatprep.subr.bf16.mxu0 %v4327_v40  ;;  %2974 = vmatprep.subr.bf16.mxu1 %v4330_v41  ;;  %v1152_v40 = vpack.c.bf16 %v1144_v32, %v1144_v32  ;;  %v4387_v41 = vld [vmem:[#allocation11 + $0x624] ss:$16 sps:$4 sm:$0xff]   ;;  %v4451_v32 = vld [vmem:[#allocation11 + $0x780] ss:$16 sps:$4 sm:$0xff]  }
 0x200   :  { %2811 = vmatpush1.bf16.msra.mxu0 %v4325_v42  ;;  %2975 = vmatpush1.bf16.msra.mxu1 %v4328_v43  ;;  %v4390_v42 = vld [vmem:[#allocation11 + $0x62c] ss:$16 sps:$4 sm:$0xff]  }
 0x201   :  { %2812 = vmatprep.subr.bf16.mxu0 %v4333_v44  ;;  %2976 = vmatprep.subr.bf16.mxu1 %v4336_v45  ;;  %v4385_v44 = vld [vmem:[#allocation11 + $0x620] ss:$16 sps:$4 sm:$0xff]   ;;  %v4388_v45 = vld [vmem:[#allocation11 + $0x628] ss:$16 sps:$4 sm:$0xff]  }
 0x204   :  { %2813 = vmatpush1.bf16.msra.mxu0 %v4331_v46  ;;  %2977 = vmatpush1.bf16.msra.mxu1 %v4334_v47  ;;  %v4393_v46 = vld [vmem:[#allocation11 + $0x644] ss:$16 sps:$4 sm:$0xff]   ;;  %v4396_v47 = vld [vmem:[#allocation11 + $0x64c] ss:$16 sps:$4 sm:$0xff]  }
 0x205   :  { %2814 = vmatprep.subr.bf16.mxu0 %v4339_v48  ;;  %2978 = vmatprep.subr.bf16.mxu1 %v4342_v49  ;;  %v4391_v48 = vld [vmem:[#allocation11 + $0x640] ss:$16 sps:$4 sm:$0xff]   ;;  %v4394_v49 = vld [vmem:[#allocation11 + $0x648] ss:$16 sps:$4 sm:$0xff]  }
 0x208   :  { %2815 = vmatpush1.bf16.msra.mxu0 %v4337_v50  ;;  %2979 = vmatpush1.bf16.msra.mxu1 %v4340_v52  ;;  %v4399_v50 = vld [vmem:[#allocation11 + $0x664] ss:$16 sps:$4 sm:$0xff]   ;;  %v4402_v52 = vld [vmem:[#allocation11 + $0x66c] ss:$16 sps:$4 sm:$0xff]  }
 0x209   :  { %2816 = vmatprep.subr.bf16.mxu0 %v4345_v53  ;;  %2980 = vmatprep.subr.bf16.mxu1 %v4348_v54  ;;  %v4397_v53 = vld [vmem:[#allocation11 + $0x660] ss:$16 sps:$4 sm:$0xff]   ;;  %v4400_v54 = vld [vmem:[#allocation11 + $0x668] ss:$16 sps:$4 sm:$0xff]  }
 0x20c   :  { %2817 = vmatpush1.bf16.msra.mxu0 %v4343_v56  ;;  %2981 = vmatpush1.bf16.msra.mxu1 %v4346_v55  ;;  %v4405_v56 = vld [vmem:[#allocation11 + $0x684] ss:$16 sps:$4 sm:$0xff]   ;;  %v4408_v55 = vld [vmem:[#allocation11 + $0x68c] ss:$16 sps:$4 sm:$0xff]  }
 0x20d   :  { %2818 = vmatprep.subr.bf16.mxu0 %v4351_v57  ;;  %2982 = vmatprep.subr.bf16.mxu1 %v4354_v19  ;;  %v4403_v57 = vld [vmem:[#allocation11 + $0x680] ss:$16 sps:$4 sm:$0xff]   ;;  %v4406_v19 = vld [vmem:[#allocation11 + $0x688] ss:$16 sps:$4 sm:$0xff]  }
 0x210   :  { %2819 = vmatpush1.bf16.msra.mxu0 %v4349_v59  ;;  %2983 = vmatpush1.bf16.msra.mxu1 %v4352_v60  ;;  %v4414_v59 = vld [vmem:[#allocation11 + $0x6ac] ss:$16 sps:$4 sm:$0xff]   ;;  %v4409_v60 = vld [vmem:[#allocation11 + $0x6a0] ss:$16 sps:$4 sm:$0xff]  }
 0x211   :  { %2820 = vmatprep.subr.bf16.mxu0 %v4357_v61  ;;  %2984 = vmatprep.subr.bf16.mxu1 %v4360_v62  ;;  %v4412_v61 = vld [vmem:[#allocation11 + $0x6a8] ss:$16 sps:$4 sm:$0xff]   ;;  %v4417_v62 = vld [vmem:[#allocation11 + $0x6c4] ss:$16 sps:$4 sm:$0xff]  }
 0x214   :  { %2821 = vmatpush1.bf16.msra.mxu0 %v4355_v0  ;;  %2985 = vmatpush1.bf16.msra.mxu1 %v4358_v1  ;;  %v4415_v0 = vld [vmem:[#allocation11 + $0x6c0] ss:$16 sps:$4 sm:$0xff]   ;;  %v4418_v1 = vld [vmem:[#allocation11 + $0x6c8] ss:$16 sps:$4 sm:$0xff]  }
 0x215   :  { %2822 = vmatprep.subr.bf16.mxu0 %v4363_v2  ;;  %2986 = vmatprep.subr.bf16.mxu1 %v4366_v3  ;;  %v4423_v2 = vld [vmem:[#allocation11 + $0x6e4] ss:$16 sps:$4 sm:$0xff]   ;;  %v4426_v3 = vld [vmem:[#allocation11 + $0x6ec] ss:$16 sps:$4 sm:$0xff]  }
 0x217   :  { %v4951_v16 = vpop.f32.mrb[8].mxu1 }
 0x218   :  { %2823 = vmatpush1.bf16.msra.mxu0 %v4361_v6  ;;  %2987 = vmatpush1.bf16.msra.mxu1 %v4364_v7  ;;  %v1103_v20 = vpop.f32.mrb[9].mxu1  ;;  %v4429_v6 = vld [vmem:[#allocation11 + $0x704] ss:$16 sps:$4 sm:$0xff]   ;;  %v4432_v7 = vld [vmem:[#allocation11 + $0x70c] ss:$16 sps:$4 sm:$0xff]  }
 0x219   :  { %2824 = vmatprep.subr.bf16.mxu0 %v4369_v8  ;;  %2988 = vmatprep.subr.bf16.mxu1 %v4372_v9  ;;  %v1104_v22 = vadd.f32 %v1103_v20, %v295_v10  ;;  %v1105_v23 = vpop.f32.mrb[10].mxu1  ;;  %v4427_v8 = vld [vmem:[#allocation11 + $0x700] ss:$16 sps:$4 sm:$0xff]   ;;  %v4430_v9 = vld [vmem:[#allocation11 + $0x708] ss:$16 sps:$4 sm:$0xff]  }
 0x21a   :  { %v1106_v26 = vpop.f32.mrb[11].mxu1  ;;  %v4435_v10 = vld [vmem:[#allocation11 + $0x724] ss:$16 sps:$4 sm:$0xff]  }
 0x21b   :  { %vm1115_vm6 = vcmp.ge.f32.partialorder %v1104_v22, 0.0  ;;  %v1123_v27 = vmul.f32 0.2, %v1104_v22  ;;  %v4441_v20 = vld [vmem:[#allocation11 + $0x744] ss:$16 sps:$4 sm:$0xff]  }
 0x21c   :  { %2825 = vmatpush1.bf16.msra.mxu0 %v4367_v17  ;;  %2989 = vmatpush1.bf16.msra.mxu1 %v4370_v18  ;;  %v4433_v17 = vld [vmem:[#allocation11 + $0x720] ss:$16 sps:$4 sm:$0xff]   ;;  %v4436_v18 = vld [vmem:[#allocation11 + $0x728] ss:$16 sps:$4 sm:$0xff]   ;;  %v4447_v23 = vld [vmem:[#allocation11 + $0x764] ss:$16 sps:$4 sm:$0xff]  }
 0x21d   :  { %2826 = vmatprep.subr.bf16.mxu0 %v4375_v51  ;;  %2990 = vmatprep.subr.bf16.mxu1 %v4378_v21  ;;  %v1131_v36 = vsel %vm1115_vm6, %v1104_v22, %v1123_v27  ;;  %v4444_v51 = vld [vmem:[#allocation11 + $0x74c] ss:$16 sps:$4 sm:$0xff]   ;;  %v4439_v21 = vld [vmem:[#allocation11 + $0x740] ss:$16 sps:$4 sm:$0xff]   ;;  %v4442_v22 = vld [vmem:[#allocation11 + $0x748] ss:$16 sps:$4 sm:$0xff]  }
 0x21e   :  { %v1147_v37 = vmul.f32 %v1139_v28, %v1131_v36  ;;  %v4445_v26 = vld [vmem:[#allocation11 + $0x760] ss:$16 sps:$4 sm:$0xff]   ;;  %v4448_v27 = vld [vmem:[#allocation11 + $0x768] ss:$16 sps:$4 sm:$0xff]   ;;  %v4453_v28 = vld [vmem:[#allocation11 + $0x784] ss:$16 sps:$4 sm:$0xff]  }
 0x21f   :  { %v4462_v36 = vld [vmem:[#allocation11 + $0x7ac] ss:$16 sps:$4 sm:$0xff]  }
 0x220   :  { %2827 = vmatpush1.bf16.msra.mxu0 %v4373_v29  ;;  %2991 = vmatpush1.bf16.msra.mxu1 %v4376_v30  ;;  %v1155_v43 = vpack.c.bf16 %v1147_v37, %v1147_v37  ;;  %v4456_v29 = vld [vmem:[#allocation11 + $0x78c] ss:$16 sps:$4 sm:$0xff]   ;;  %v291_v30 = vrot.slane %v4922_v14, %v290_v25  ;;  %v4463_v14 = vld [vmem:[#allocation11 + $0x7c0] ss:$16 sps:$4 sm:$0xff]  }
 0x221   :  { %2837 = vmatprep.subr.bf16.mxu0 %v4381_v33  ;;  %3001 = vmatprep.subr.bf16.mxu1 %v4384_v35  ;;  %v4454_v33 = vld [vmem:[#allocation11 + $0x788] ss:$16 sps:$4 sm:$0xff]   ;;  %v4459_v35 = vld [vmem:[#allocation11 + $0x7a4] ss:$16 sps:$4 sm:$0xff]   ;;  %v4959_v25 = vld [vmem:[%s4994_s7] sm:$0xf] }
 0x222   :  { %v1102_v37 = vadd.f32 %v4951_v16, %v291_v30  ;;  %v1138_v16 = vld [vmem:[#allocation5 + $0x30] sm:$0xff] }
 0x223   :  { %2829 = vmatmul.mubr.bf16.vlgmr.msra.gmra.mrb[4].mxu0 %v1152_v40  ;;  %2993 = vmatmul.mubr.bf16.vlgmr.msra.gmra.mrb[12].mxu1 %v1152_v40  ;;  %v4465_v40 = vld [vmem:[#allocation11 + $0x7c4] ss:$16 sps:$4 sm:$0xff]  }
 0x224   :  { %2838 = vmatpush1.bf16.msra.mxu0 %v4379_v38  ;;  %3002 = vmatpush1.bf16.msra.mxu1 %v4382_v39  ;;  %v4457_v38 = vld [vmem:[#allocation11 + $0x7a0] ss:$16 sps:$4 sm:$0xff]   ;;  %v4460_v39 = vld [vmem:[#allocation11 + $0x7a8] ss:$16 sps:$4 sm:$0xff]   ;;  %vm1114_vm7 = vcmp.ge.f32.partialorder %v1102_v37, 0.0 }
 0x225   :  { %2839 = vmatprep.subr.bf16.mxu0 %v4387_v41  ;;  %3003 = vmatprep.subr.bf16.mxu1 %v4390_v42  ;;  %v4468_v41 = vld [vmem:[#allocation11 + $0x7cc] ss:$16 sps:$4 sm:$0xff]   ;;  %v1122_v42 = vmul.f32 0.2, %v1102_v37 }
 0x226   :  { %2869 = vmatprep.mubr.bf16.mxu0 %v1155_v43  ;;  %3033 = vmatprep.mubr.bf16.mxu1 %v1155_v43  ;;  %v4466_v43 = vld [vmem:[#allocation11 + $0x7c8] ss:$16 sps:$4 sm:$0xff]  }
 0x228   :  { %2840 = vmatpush1.bf16.msra.mxu0 %v4385_v44  ;;  %3004 = vmatpush1.bf16.msra.mxu1 %v4388_v45  ;;  %v4471_v44 = vld [vmem:[#allocation11 + $0x7e4] ss:$16 sps:$4 sm:$0xff]   ;;  %v4474_v45 = vld [vmem:[#allocation11 + $0x7ec] ss:$16 sps:$4 sm:$0xff]  }
 0x229   :  { %2841 = vmatprep.subr.bf16.mxu0 %v4393_v46  ;;  %3005 = vmatprep.subr.bf16.mxu1 %v4396_v47  ;;  %v1130_v46 = vsel %vm1114_vm7, %v1102_v37, %v1122_v42  ;;  %v4469_v47 = vld [vmem:[#allocation11 + $0x7e0] ss:$16 sps:$4 sm:$0xff]   ;;  %v3055_v42 = vld [vmem:[#allocation7 + $0x8] sm:$0xff] }
 0x22c   :  { %2842 = vmatpush1.bf16.msra.mxu0 %v4391_v48  ;;  %3006 = vmatpush1.bf16.msra.mxu1 %v4394_v49  ;;  %v4472_v48 = vld [vmem:[#allocation11 + $0x7e8] ss:$16 sps:$4 sm:$0xff]   ;;  %v1146_v49 = vmul.f32 %v1138_v16, %v1130_v46 }
 0x22d   :  { %2843 = vmatprep.subr.bf16.mxu0 %v4399_v50  ;;  %3007 = vmatprep.subr.bf16.mxu1 %v4402_v52  ;;  %v4477_v50 = vld [vmem:[#allocation13 + $0x4] ss:$8 sps:$4 sm:$0xff]   ;;  %v4475_v52 = vld [vmem:[#allocation13] ss:$8 sps:$4 sm:$0xff]  }
 0x230   :  { %2844 = vmatpush1.bf16.msra.mxu0 %v4397_v53  ;;  %3008 = vmatpush1.bf16.msra.mxu1 %v4400_v54  ;;  %v1154_v53 = vpack.c.bf16 %v1146_v49, %v1146_v49  ;;  %v4480_v54 = vld [vmem:[#allocation13 + $0x14] ss:$8 sps:$4 sm:$0xff]  }
 0x231   :  { %2845 = vmatprep.subr.bf16.mxu0 %v4405_v56  ;;  %3009 = vmatprep.subr.bf16.mxu1 %v4408_v55  ;;  %v4478_v56 = vld [vmem:[#allocation13 + $0x10] ss:$8 sps:$4 sm:$0xff]   ;;  %v4483_v55 = vld [vmem:[#allocation13 + $0x24] ss:$8 sps:$4 sm:$0xff]  }
 0x234   :  { %2846 = vmatpush1.bf16.msra.mxu0 %v4403_v57  ;;  %3010 = vmatpush1.bf16.msra.mxu1 %v4406_v19  ;;  %v4481_v57 = vld [vmem:[#allocation13 + $0x20] ss:$8 sps:$4 sm:$0xff]   ;;  %v4486_v19 = vld [vmem:[#allocation13 + $0x34] ss:$8 sps:$4 sm:$0xff]  }
 0x235   :  { %2847 = vmatprep.subr.bf16.mxu0 %v4411_v58  ;;  %3011 = vmatprep.subr.bf16.mxu1 %v4414_v59  ;;  %v4484_v58 = vld [vmem:[#allocation13 + $0x30] ss:$8 sps:$4 sm:$0xff]   ;;  %v4489_v59 = vld [vmem:[#allocation13 + $0x44] ss:$8 sps:$4 sm:$0xff]  }
 0x238   :  { %2848 = vmatpush1.bf16.msra.mxu0 %v4409_v60  ;;  %3012 = vmatpush1.bf16.msra.mxu1 %v4412_v61  ;;  %v4487_v60 = vld [vmem:[#allocation13 + $0x40] ss:$8 sps:$4 sm:$0xff]   ;;  %v4492_v61 = vld [vmem:[#allocation13 + $0x54] ss:$8 sps:$4 sm:$0xff]  }
 0x239   :  { %2849 = vmatprep.subr.bf16.mxu0 %v4417_v62  ;;  %3013 = vmatprep.subr.bf16.mxu1 %v4420_v63  ;;  %v4490_v62 = vld [vmem:[#allocation13 + $0x50] ss:$8 sps:$4 sm:$0xff]   ;;  %v4495_v63 = vld [vmem:[#allocation13 + $0x64] ss:$8 sps:$4 sm:$0xff]  }
 0x23c   :  { %2850 = vmatpush1.bf16.msra.mxu0 %v4415_v0  ;;  %3014 = vmatpush1.bf16.msra.mxu1 %v4418_v1  ;;  %v4493_v0 = vld [vmem:[#allocation13 + $0x60] ss:$8 sps:$4 sm:$0xff]   ;;  %v4498_v1 = vld [vmem:[#allocation13 + $0x74] ss:$8 sps:$4 sm:$0xff]  }
 0x23d   :  { %2851 = vmatprep.subr.bf16.mxu0 %v4423_v2  ;;  %3015 = vmatprep.subr.bf16.mxu1 %v4426_v3  ;;  %v4496_v2 = vld [vmem:[#allocation13 + $0x70] ss:$8 sps:$4 sm:$0xff]   ;;  %v4501_v3 = vld [vmem:[#allocation13 + $0x84] ss:$8 sps:$4 sm:$0xff]  }
 0x240   :  { %2852 = vmatpush1.bf16.msra.mxu0 %v4421_v4  ;;  %3016 = vmatpush1.bf16.msra.mxu1 %v4424_v5  ;;  %v4499_v4 = vld [vmem:[#allocation13 + $0x80] ss:$8 sps:$4 sm:$0xff]   ;;  %v4504_v5 = vld [vmem:[#allocation13 + $0x94] ss:$8 sps:$4 sm:$0xff]  }
 0x241   :  { %2853 = vmatprep.subr.bf16.mxu0 %v4429_v6  ;;  %3017 = vmatprep.subr.bf16.mxu1 %v4432_v7  ;;  %v4502_v6 = vld [vmem:[#allocation13 + $0x90] ss:$8 sps:$4 sm:$0xff]   ;;  %v4507_v7 = vld [vmem:[#allocation13 + $0xa4] ss:$8 sps:$4 sm:$0xff]  }
 0x244   :  { %2854 = vmatpush1.bf16.msra.mxu0 %v4427_v8  ;;  %3018 = vmatpush1.bf16.msra.mxu1 %v4430_v9  ;;  %v4505_v8 = vld [vmem:[#allocation13 + $0xa0] ss:$8 sps:$4 sm:$0xff]   ;;  %v4510_v9 = vld [vmem:[#allocation13 + $0xb4] ss:$8 sps:$4 sm:$0xff]  }
 0x245   :  { %2855 = vmatprep.subr.bf16.mxu0 %v4435_v10  ;;  %3019 = vmatprep.subr.bf16.mxu1 %v4438_v11  ;;  %v4508_v10 = vld [vmem:[#allocation13 + $0xb0] ss:$8 sps:$4 sm:$0xff]   ;;  %v4513_v11 = vld [vmem:[#allocation13 + $0xc4] ss:$8 sps:$4 sm:$0xff]  }
 0x248   :  { %2856 = vmatpush1.bf16.msra.mxu0 %v4433_v17  ;;  %3020 = vmatpush1.bf16.msra.mxu1 %v4436_v18  ;;  %v4511_v17 = vld [vmem:[#allocation13 + $0xc0] ss:$8 sps:$4 sm:$0xff]   ;;  %v4516_v18 = vld [vmem:[#allocation13 + $0xd4] ss:$8 sps:$4 sm:$0xff]  }
 0x249   :  { %2857 = vmatprep.subr.bf16.mxu0 %v4441_v20  ;;  %3021 = vmatprep.subr.bf16.mxu1 %v4444_v51  ;;  %v4514_v20 = vld [vmem:[#allocation13 + $0xd0] ss:$8 sps:$4 sm:$0xff]   ;;  %v4519_v51 = vld [vmem:[#allocation13 + $0xe4] ss:$8 sps:$4 sm:$0xff]  }
 0x24c   :  { %2858 = vmatpush1.bf16.msra.mxu0 %v4439_v21  ;;  %3022 = vmatpush1.bf16.msra.mxu1 %v4442_v22  ;;  %v4517_v21 = vld [vmem:[#allocation13 + $0xe0] ss:$8 sps:$4 sm:$0xff]   ;;  %v4522_v22 = vld [vmem:[#allocation13 + $0xf4] ss:$8 sps:$4 sm:$0xff]  }
 0x24d   :  { %2859 = vmatprep.subr.bf16.mxu0 %v4447_v23  ;;  %3023 = vmatprep.subr.bf16.mxu1 %v4450_v24  ;;  %v4520_v23 = vld [vmem:[#allocation13 + $0xf0] ss:$8 sps:$4 sm:$0xff]   ;;  %v4525_v24 = vld [vmem:[#allocation13 + $0x104] ss:$8 sps:$4 sm:$0xff]  }
 0x250   :  { %2860 = vmatpush1.bf16.msra.mxu0 %v4445_v26  ;;  %3024 = vmatpush1.bf16.msra.mxu1 %v4448_v27  ;;  %v1417_v26 = vrot.slane %v4959_v25, %v4917_v13  ;;  %v1421_v27 = vrot.slane %v4959_v25, %v4925_v15 }
 0x251   :  { %2861 = vmatprep.subr.bf16.mxu0 %v4453_v28  ;;  %3025 = vmatprep.subr.bf16.mxu1 %v4456_v29  ;;  %v1429_v28 = vrot.slane %v4959_v25, %v278_v34 }
 0x254   :  { %2862 = vmatpush1.bf16.msra.mxu0 %v4451_v32  ;;  %3026 = vmatpush1.bf16.msra.mxu1 %v4454_v33 }
 0x255   :  { %2863 = vmatprep.subr.bf16.mxu0 %v4459_v35  ;;  %3027 = vmatprep.subr.bf16.mxu1 %v4462_v36 }
 0x258   :  { %2864 = vmatpush1.bf16.msra.mxu0 %v4457_v38  ;;  %3028 = vmatpush1.bf16.msra.mxu1 %v4460_v39 }
 0x259   :  { %2865 = vmatprep.subr.bf16.mxu0 %v4465_v40  ;;  %3029 = vmatprep.subr.bf16.mxu1 %v4468_v41  ;;  %v3054_v41 = vld [vmem:[#allocation7] sm:$0xff] }
 0x25c   :  { %2866 = vmatpush1.bf16.msra.mxu0 %v4463_v14  ;;  %3030 = vmatpush1.bf16.msra.mxu1 %v4466_v43  ;;  %v3057_v14 = vld [vmem:[#allocation7 + $0x18] sm:$0xff] }
 0x25d   :  { %2867 = vmatprep.subr.bf16.mxu0 %v4471_v44  ;;  %3031 = vmatprep.subr.bf16.mxu1 %v4474_v45 }
 0x260   :  { %2868 = vmatpush1.bf16.msra.mxu0 %v4469_v47  ;;  %3032 = vmatpush1.bf16.msra.mxu1 %v4472_v48 }
 0x261   :  { %3462 = vmatprep.subr.bf16.mxu0 %v4477_v50 }
 0x263   :  { %2870 = vmatmul.mubr.bf16.vlgmr.msra.gmra.mrb[4].mxu0 %v1154_v53  ;;  %3034 = vmatmul.mubr.bf16.vlgmr.msra.gmra.mrb[12].mxu1 %v1154_v53  ;;  %v4523_v53 = vld [vmem:[#allocation13 + $0x100] ss:$8 sps:$4 sm:$0xff]  }
 0x264   :  { %3463 = vmatpush1.bf16.msra.mxu0 %v4475_v52 }
 0x265   :  { %3464 = vmatprep.subr.bf16.mxu0 %v4480_v54 }
 0x268   :  { %3465 = vmatpush1.bf16.msra.mxu0 %v4478_v56  ;;  %v4528_v56 = vld [vmem:[#allocation13 + $0x114] ss:$8 sps:$4 sm:$0xff]  }
 0x269   :  { %3466 = vmatprep.subr.bf16.mxu0 %v4483_v55 }
 0x26c   :  { %3467 = vmatpush1.bf16.msra.mxu0 %v4481_v57  ;;  %v4526_v57 = vld [vmem:[#allocation13 + $0x110] ss:$8 sps:$4 sm:$0xff]  }
 0x26d   :  { %3468 = vmatprep.subr.bf16.mxu0 %v4486_v19  ;;  %v4531_v19 = vld [vmem:[#allocation13 + $0x124] ss:$8 sps:$4 sm:$0xff]  }
 0x270   :  { %3469 = vmatpush1.bf16.msra.mxu0 %v4484_v58  ;;  %v4529_v58 = vld [vmem:[#allocation13 + $0x120] ss:$8 sps:$4 sm:$0xff]  }
 0x271   :  { %3470 = vmatprep.subr.bf16.mxu0 %v4489_v59  ;;  %v4534_v59 = vld [vmem:[#allocation13 + $0x134] ss:$8 sps:$4 sm:$0xff]  }
 0x274   :  { %3471 = vmatpush1.bf16.msra.mxu0 %v4487_v60  ;;  %v4532_v60 = vld [vmem:[#allocation13 + $0x130] ss:$8 sps:$4 sm:$0xff]  }
 0x275   :  { %3472 = vmatprep.subr.bf16.mxu0 %v4492_v61  ;;  %v4537_v61 = vld [vmem:[#allocation13 + $0x144] ss:$8 sps:$4 sm:$0xff]  }
 0x278   :  { %3473 = vmatpush1.bf16.msra.mxu0 %v4490_v62  ;;  %v4535_v62 = vld [vmem:[#allocation13 + $0x140] ss:$8 sps:$4 sm:$0xff]  }
 0x279   :  { %3474 = vmatprep.subr.bf16.mxu0 %v4495_v63  ;;  %v4540_v63 = vld [vmem:[#allocation13 + $0x154] ss:$8 sps:$4 sm:$0xff]  }
 0x27c   :  { %3475 = vmatpush1.bf16.msra.mxu0 %v4493_v0  ;;  %v4538_v0 = vld [vmem:[#allocation13 + $0x150] ss:$8 sps:$4 sm:$0xff]  }
 0x27d   :  { %3476 = vmatprep.subr.bf16.mxu0 %v4498_v1  ;;  %v4543_v1 = vld [vmem:[#allocation13 + $0x164] ss:$8 sps:$4 sm:$0xff]  }
 0x280   :  { %3477 = vmatpush1.bf16.msra.mxu0 %v4496_v2  ;;  %v4541_v2 = vld [vmem:[#allocation13 + $0x160] ss:$8 sps:$4 sm:$0xff]  }
 0x281   :  { %3478 = vmatprep.subr.bf16.mxu0 %v4501_v3  ;;  %v4546_v3 = vld [vmem:[#allocation13 + $0x174] ss:$8 sps:$4 sm:$0xff]  }
 0x284   :  { %3479 = vmatpush1.bf16.msra.mxu0 %v4499_v4  ;;  %v4544_v4 = vld [vmem:[#allocation13 + $0x170] ss:$8 sps:$4 sm:$0xff]  }
 0x285   :  { %3480 = vmatprep.subr.bf16.mxu0 %v4504_v5  ;;  %v4549_v5 = vld [vmem:[#allocation13 + $0x184] ss:$8 sps:$4 sm:$0xff]  }
 0x288   :  { %3481 = vmatpush1.bf16.msra.mxu0 %v4502_v6  ;;  %v4547_v6 = vld [vmem:[#allocation13 + $0x180] ss:$8 sps:$4 sm:$0xff]  }
 0x289   :  { %3482 = vmatprep.subr.bf16.mxu0 %v4507_v7  ;;  %v4552_v7 = vld [vmem:[#allocation13 + $0x194] ss:$8 sps:$4 sm:$0xff]  }
 0x28c   :  { %3483 = vmatpush1.bf16.msra.mxu0 %v4505_v8  ;;  %v4550_v8 = vld [vmem:[#allocation13 + $0x190] ss:$8 sps:$4 sm:$0xff]  }
 0x28d   :  { %3484 = vmatprep.subr.bf16.mxu0 %v4510_v9  ;;  %v4555_v9 = vld [vmem:[#allocation13 + $0x1a4] ss:$8 sps:$4 sm:$0xff]  }
 0x290   :  { %3485 = vmatpush1.bf16.msra.mxu0 %v4508_v10  ;;  %v4553_v10 = vld [vmem:[#allocation13 + $0x1a0] ss:$8 sps:$4 sm:$0xff]  }
 0x291   :  { %3486 = vmatprep.subr.bf16.mxu0 %v4513_v11  ;;  %v4558_v11 = vld [vmem:[#allocation13 + $0x1b4] ss:$8 sps:$4 sm:$0xff]  }
 0x294   :  { %3487 = vmatpush1.bf16.msra.mxu0 %v4511_v17  ;;  %v4556_v17 = vld [vmem:[#allocation13 + $0x1b0] ss:$8 sps:$4 sm:$0xff]  }
 0x295   :  { %3488 = vmatprep.subr.bf16.mxu0 %v4516_v18  ;;  %v4561_v18 = vld [vmem:[#allocation13 + $0x1c4] ss:$8 sps:$4 sm:$0xff]  }
 0x298   :  { %3489 = vmatpush1.bf16.msra.mxu0 %v4514_v20  ;;  %v1425_v20 = vrot.slane %v4959_v25, %v274_v31  ;;  %v4568_v31 = vld [vmem:[#allocation13 + $0x1f0] ss:$8 sps:$4 sm:$0xff]  }
 0x299   :  { %3490 = vmatprep.subr.bf16.mxu0 %v4519_v51  ;;  %v4559_v51 = vld [vmem:[#allocation13 + $0x1c0] ss:$8 sps:$4 sm:$0xff]  }
 0x29c   :  { %3491 = vmatpush1.bf16.msra.mxu0 %v4517_v21  ;;  %v4564_v21 = vld [vmem:[#allocation13 + $0x1d4] ss:$8 sps:$4 sm:$0xff]  }
 0x29d   :  { %3492 = vmatprep.subr.bf16.mxu0 %v4522_v22 }
 0x2a0   :  { %3493 = vmatpush1.bf16.msra.mxu0 %v4520_v23  ;;  %v4562_v23 = vld [vmem:[#allocation13 + $0x1d0] ss:$8 sps:$4 sm:$0xff]  }
 0x2a1   :  { %3503 = vmatprep.subr.bf16.mxu0 %v4525_v24  ;;  %v4567_v24 = vld [vmem:[#allocation13 + $0x1e4] ss:$8 sps:$4 sm:$0xff]  }
 0x336   :  { %v2871_v29 = vpop.f32.mrb[4].mxu0  ;;  %v4968_v30 = vpop.f32.mrb[12].mxu1 }
 0x337   :  { %v4044_v32 = vadd.f32 %v2871_v29, %v1417_v26  ;;  %v2873_v33 = vpop.f32.mrb[5].mxu0  ;;  %v3037_v35 = vpop.f32.mrb[13].mxu1  ;;  %v4046_v22 = vadd.f32 %v4968_v30, %v1425_v20  ;;  %v3130_v30 = vld [vmem:[%s4996_s9] sm:$0x3] }
 0x338   :  { %v4045_v36 = vadd.f32 %v2873_v33, %v1421_v27  ;;  %v4047_v37 = vadd.f32 %v3037_v35, %v1429_v28  ;;  %v2875_v38 = vpop.f32.mrb[6].mxu0  ;;  %v3039_v39 = vpop.f32.mrb[14].mxu1  ;;  %v4565_v27 = vld [vmem:[#allocation13 + $0x1e0] ss:$8 sps:$4 sm:$0xff]   ;;  %v4570_v28 = vld [vmem:[#allocation13 + $0x1f4] ss:$8 sps:$4 sm:$0xff]   ;;  %v3135_v33 = vrot.slane %v3130_v30, %v4917_v13  ;;  %v3139_v35 = vrot.slane %v3130_v30, %v4925_v15 }
 0x339   :  { %vm3042_vm8 = vcmp.ge.f32.partialorder %v4044_v32, 0.0  ;;  %v3046_v40 = vmul.f32 0.2, %v4044_v32  ;;  %v2876_v45 = vpop.f32.mrb[7].mxu0  ;;  %v3040_v46 = vpop.f32.mrb[15].mxu1  ;;  %vm3044_vm11 = vcmp.ge.f32.partialorder %v4046_v22, 0.0 }
 0x33a   :  { %vm3043_vm9 = vcmp.ge.f32.partialorder %v4045_v36, 0.0  ;;  %v3047_v43 = vmul.f32 0.2, %v4045_v36  ;;  %vm3045_vm10 = vcmp.ge.f32.partialorder %v4047_v37, 0.0  ;;  %v3049_v44 = vmul.f32 0.2, %v4047_v37 }
 0x33b   :  { %v3050_v34 = vsel %vm3042_vm8, %v4044_v32, %v3046_v40  ;;  %v3048_v26 = vmul.f32 0.2, %v4046_v22  ;;  %v3554_v39 = vld [vmem:[%s4997_s10] sm:$0x3] }
 0x33c   :  { %v3058_v16 = vmul.f32 %v3054_v41, %v3050_v34  ;;  %v3051_v47 = vsel %vm3043_vm9, %v4045_v36, %v3047_v43  ;;  %v3053_v48 = vsel %vm3045_vm10, %v4047_v37, %v3049_v44  ;;  %v3550_v43 = vld [vmem:[#allocation8] sm:$0xff]  ;;  %v3551_v34 = vld [vmem:[#allocation8 + $0x8] sm:$0xff]  ;;  %v3559_v45 = vrot.slane %v3554_v39, %v4917_v13 }
 0x33d   :  { %v3059_v49 = vmul.f32 %v3055_v42, %v3051_v47  ;;  %v3061_v50 = vmul.f32 %v3057_v14, %v3053_v48  ;;  %v3052_v29 = vsel %vm3044_vm11, %v4046_v22, %v3048_v26 }
 0x33e   :  { %v3062_v54 = vpack.c.bf16 %v3058_v16, %v3058_v16  ;;  %v3060_v25 = vmul.f32 %v3056_v12, %v3052_v29  ;;  %v3563_v16 = vrot.slane %v3554_v39, %v4925_v15 }
 0x33f   :  { %v3063_v52 = vpack.c.bf16 %v3059_v49, %v3059_v49  ;;  %v3065_v55 = vpack.c.bf16 %v3061_v50, %v3061_v50 }
 0x340   :  { %v3064_v32 = vpack.c.bf16 %v3060_v25, %v3060_v25 }
 0x341   :  { %3494 = vmatprep.mubr.bf16.mxu0 %v3063_v52 }
 0x342   :  { %3495 = vmatmul.mubr.bf16.vlgmr.msra.gmra.mrb[8].mxu0 %v3062_v54  ;;  %v4043_v54 = vld [vmem:[#allocation2] ss:$0 sm:$0xff] }
 0x343   :  { %3504 = vmatpush1.bf16.msra.mxu0 %v4523_v53  ;;  %3535 = vmatprep.mubr.bf16.mxu0 %v3065_v55 }
 0x344   :  { %3505 = vmatprep.subr.bf16.mxu0 %v4528_v56 }
 0x347   :  { %3506 = vmatpush1.bf16.msra.mxu0 %v4526_v57 }
 0x348   :  { %3507 = vmatprep.subr.bf16.mxu0 %v4531_v19 }
 0x34b   :  { %3508 = vmatpush1.bf16.msra.mxu0 %v4529_v58 }
 0x34c   :  { %3509 = vmatprep.subr.bf16.mxu0 %v4534_v59 }
 0x34f   :  { %3510 = vmatpush1.bf16.msra.mxu0 %v4532_v60 }
 0x350   :  { %3511 = vmatprep.subr.bf16.mxu0 %v4537_v61 }
 0x353   :  { %3512 = vmatpush1.bf16.msra.mxu0 %v4535_v62 }
 0x354   :  { %3513 = vmatprep.subr.bf16.mxu0 %v4540_v63 }
 0x357   :  { %3514 = vmatpush1.bf16.msra.mxu0 %v4538_v0 }
 0x358   :  { %3515 = vmatprep.subr.bf16.mxu0 %v4543_v1 }
 0x35b   :  { %3516 = vmatpush1.bf16.msra.mxu0 %v4541_v2 }
 0x35c   :  { %3517 = vmatprep.subr.bf16.mxu0 %v4546_v3 }
 0x35f   :  { %3518 = vmatpush1.bf16.msra.mxu0 %v4544_v4 }
 0x360   :  { %3519 = vmatprep.subr.bf16.mxu0 %v4549_v5 }
 0x363   :  { %3520 = vmatpush1.bf16.msra.mxu0 %v4547_v6 }
 0x364   :  { %3521 = vmatprep.subr.bf16.mxu0 %v4552_v7 }
 0x367   :  { %3522 = vmatpush1.bf16.msra.mxu0 %v4550_v8 }
 0x368   :  { %3523 = vmatprep.subr.bf16.mxu0 %v4555_v9 }
 0x36b   :  { %3524 = vmatpush1.bf16.msra.mxu0 %v4553_v10 }
 0x36c   :  { %3525 = vmatprep.subr.bf16.mxu0 %v4558_v11 }
 0x36f   :  { %3526 = vmatpush1.bf16.msra.mxu0 %v4556_v17 }
 0x370   :  { %3527 = vmatprep.subr.bf16.mxu0 %v4561_v18 }
 0x373   :  { %3528 = vmatpush1.bf16.msra.mxu0 %v4559_v51 }
 0x374   :  { %3529 = vmatprep.subr.bf16.mxu0 %v4564_v21 }
 0x377   :  { %3530 = vmatpush1.bf16.msra.mxu0 %v4562_v23 }
 0x378   :  { %3531 = vmatprep.subr.bf16.mxu0 %v4567_v24 }
 0x37b   :  { %3532 = vmatpush1.bf16.msra.mxu0 %v4565_v27 }
 0x37c   :  { %3533 = vmatprep.subr.bf16.mxu0 %v4570_v28 }
 0x37f   :  { %3534 = vmatpush1.bf16.msra.mxu0 %v4568_v31 }
 0x382   :  { %3536 = vmatmul.mubr.bf16.vlgmr.msra.gmra.mrb[8].mxu0 %v3064_v32 }
 0x455   :  { %v3537_v36 = vpop.f32.mrb[8].mxu0 }
 0x456   :  { %v4048_v37 = vadd.f32 %v3537_v36, %v3135_v33  ;;  %v3539_v38 = vpop.f32.mrb[9].mxu0 }
 0x457   :  { %v4049_v40 = vadd.f32 %v3539_v38, %v3139_v35  ;;  %v3541_v41 = vpop.f32.mrb[10].mxu0 }
 0x458   :  { %vm3544_vm12 = vcmp.ge.f32.partialorder %v4048_v37, 0.0  ;;  %v3546_v42 = vmul.f32 0.2, %v4048_v37  ;;  %v3542_v14 = vpop.f32.mrb[11].mxu0 }
 0x459   :  { %vm3545_vm13 = vcmp.ge.f32.partialorder %v4049_v40, 0.0  ;;  %v3547_v44 = vmul.f32 0.2, %v4049_v40 }
 0x45a   :  { %v3548_v46 = vsel %vm3544_vm12, %v4048_v37, %v3546_v42 }
 0x45b   :  { %v3549_v47 = vsel %vm3545_vm13, %v4049_v40, %v3547_v44  ;;  %v3552_v48 = vmul.f32 %v3550_v43, %v3548_v46 }
 0x45c   :  { %v3553_v49 = vmul.f32 %v3551_v34, %v3549_v47 }
 0x45d   :  { %v3566_v50 = vmul.f32 %v3559_v45, %v3552_v48 }
 0x45e   :  { %v3567_v52 = vmul.f32 %v3563_v16, %v3553_v49 }
 0x460   :  { %v3568_v53 = vadd.f32 %v3567_v52, %v3566_v50 }
 0x462   :  { %3569 = vadd.xlane.f32.xlu0 %v3568_v53 }
 0x4ef   :  { %v3570_v56 = vpop.xlane.xlu0 %3569 }
 0x4f0   :  { %v3578_v55 = vadd.f32 %v4043_v54, %v3570_v56 }
 0x4f2   :  { %v3579_v57 = vsub.f32 0.0, %v3578_v55 }
 0x4f4   :  { %v3580_v19 = vmul.f32 1.442695, %v3579_v57 }
 0x4f6   :  { %4571 = vpow2.f32 %v3580_v19 }
 0x500   :  { %v4572_v58 = vpop.eup %4571 }
 0x501   :  { %v3582_v59 = vadd.f32 1.0, %v4572_v58 }
 0x503   :  { %4573 = vrcp.f32 %v3582_v59 }
 0x50d   :  { %v4574_v13 = vpop.eup %4573 }
 0x50e   :  { %3586 = vst.msk [vmem:[%s4999_s12] sm:$0xff] %vm3585_vm14, %v4574_v13 }
 0x50f   :  { %3591 = vsyncpa [#allocation4], 1 }
 0x510   :  { %3592 = vsyncpa [#allocation6], 1 }
 0x511   :  { %3593 = vsyncpa [#allocation9], 1 }
 0x512   :  { %3594 = vsyncpa [#allocation12], 1 }

</bundles_post_ra>
